<compile_context>
chip_gen: v5e
topology: v5e:2x2
jax: 0.10.0
libtpu: 0.0.40
codegen_flags: <defaults>
</compile_context>

<pallas_src>
import jax
import jax.numpy as jnp
from jax.experimental import pallas as pl
from jax.experimental.pallas import tpu as pltpu


# ---------------------------------------------------------------------------
# Kernel 1: GRU recurrence (input projection hoisted, time loop unrolled).
# ---------------------------------------------------------------------------
def gru_kernel(x_ref, h0_ref, w_ih_ref, w_hh_ref, b_ih_ref, b_hh_ref,
               hseq_ref, h_out_ref):
    """One batch-chunk of the GRU.

    x_ref:    (T, bb, Ep)  time-major embedded inputs (f32, padded)
    h0_ref:   (bb, Hp)     initial hidden state
    w_ih_ref: (Ep, 3*Hp)   bf16, gate blocks [r | z | n], each lane-aligned
    w_hh_ref: (Hp, 3*Hp)   bf16
    b_ih_ref, b_hh_ref: (1, 3*Hp) f32
    hseq_ref: (bb, T, Hp)  batch-major per-step hidden states (output)
    h_out_ref:(bb, Hp)     final hidden state (output)
    """
    T, bb, Ep = x_ref.shape
    Hp = h0_ref.shape[1]

    w_ih = w_ih_ref[...]
    w_hh = w_hh_ref[...]
    b_ih = b_ih_ref[...]
    b_hh = b_hh_ref[...]

    # Hoisted input projection: one (T*bb, Ep) @ (Ep, 3Hp) MXU matmul for all timesteps.
    x_flat = x_ref[...].reshape(T * bb, Ep).astype(jnp.bfloat16)
    gi_all = jnp.dot(x_flat, w_ih, preferred_element_type=jnp.float32) + b_ih  # (T*bb, 3Hp)

    h = h0_ref[...]                                   # (bb, Hp) f32
    # Static unroll: T is a small compile-time constant here.
    # TODO(synk): for long sequences switch to lax.fori_loop with a time-major hseq store.
    for t in range(T):
        gi = gi_all[t * bb:(t + 1) * bb, :]           # 8-row aligned static slice
        gh = jnp.dot(h.astype(jnp.bfloat16), w_hh,
                     preferred_element_type=jnp.float32) + b_hh
        # PyTorch GRU gate order: [r, z, n]; slices are lane-aligned (Hp % 128 == 0).
        r = jax.nn.sigmoid(gi[:, :Hp] + gh[:, :Hp])
        z = jax.nn.sigmoid(gi[:, Hp:2 * Hp] + gh[:, Hp:2 * Hp])
        n = jnp.tanh(gi[:, 2 * Hp:] + r * gh[:, 2 * Hp:])
        h = n + z * (h - n)                           # == (1 - z) * n + z * h
        hseq_ref[:, t, :] = h                         # batch-major store, static index
    h_out_ref[...] = h


# ---------------------------------------------------------------------------
# Kernel 2: dropout(0.5) + classifier matmul, tiled over (rows, vocab).
# ---------------------------------------------------------------------------
def dropout_classifier_kernel(h_ref, m_ref, w_ref, b_ref, out_ref):
    """h_ref: (tm, Hp) GRU outputs; m_ref: (tm, Hp) dropout mask in {0., 2.};
    w_ref: (Hp, tn) bf16 classifier weights; b_ref: (1, tn); out_ref: (tm, tn) f32."""
    h = (h_ref[...] * m_ref[...]).astype(jnp.bfloat16)
    out_ref[...] = (jnp.dot(h, w_ref[...], preferred_element_type=jnp.float32)
                    + b_ref[...]).astype(out_ref.dtype)


# ---------------------------------------------------------------------------
# Parameter init (mirrors the nn.Module layout).
# ---------------------------------------------------------------------------
def init_generator_params(key, vocab_size, embedding_size, hidden_size):
    ks = jax.random.split(key, 7)
    k = 1.0 / jnp.sqrt(jnp.float32(hidden_size))
    emb = jax.random.normal(ks[0], (vocab_size, embedding_size), jnp.float32)
    emb = emb.at[0].set(0.0)  # padding_idx=0
    return dict(
        embedding=emb,
        w_ih=jax.random.uniform(ks[1], (3 * hidden_size, embedding_size), jnp.float32, -k, k),
        w_hh=jax.random.uniform(ks[2], (3 * hidden_size, hidden_size), jnp.float32, -k, k),
        b_ih=jax.random.uniform(ks[3], (3 * hidden_size,), jnp.float32, -k, k),
        b_hh=jax.random.uniform(ks[4], (3 * hidden_size,), jnp.float32, -k, k),
        w_c=jax.random.uniform(ks[5], (vocab_size, hidden_size), jnp.float32, -k, k),
        b_c=jax.random.uniform(ks[6], (vocab_size,), jnp.float32, -k, k),
    )


def _round_up(x, m):
    return ((x + m - 1) // m) * m


def _pad_to(a, shape):
    return jnp.pad(a, [(0, s - d) for d, s in zip(a.shape, shape)])


def _pick_tile(n, candidates):
    for c in candidates:
        if n % c == 0:
            return c
    return n


# ---------------------------------------------------------------------------
# Forward pass (matches Generator.forward semantics).
# ---------------------------------------------------------------------------
def generator_forward(params, inputs, use_softmax=False, hidden=None, dropout_rng=None):
    """inputs: int32 token ids (B, T). Returns (output (B,T,V), hidden (1,B,H))."""
    B, T = inputs.shape
    V, E = params["embedding"].shape
    H = params["w_hh"].shape[1]

    # Padded (vreg-aligned) sizes: lanes -> 128, sublanes -> 8.
    Bp = _round_up(B, 8)
    Ep = _round_up(E, 128)
    Hp = _round_up(H, 128)
    Vp = _round_up(V, 128)
    R = Bp * T                       # classifier rows (batch-major)

    # --- glue: embedding gather + padding / layout prep -----------------------------
    embedded = jnp.take(params["embedding"], inputs, axis=0)          # (B, T, E)
    x_tm = jnp.zeros((T, Bp, Ep), jnp.float32)
    x_tm = x_tm.at[:, :B, :E].set(jnp.transpose(embedded, (1, 0, 2)).astype(jnp.float32))

    if hidden is None:
        hidden = jnp.zeros((1, B, H), jnp.float32)                    # (num_layers=1, B, H)
    h0_p = _pad_to(hidden[0].astype(jnp.float32), (Bp, Hp))

    # GRU weights: pad each of the 3 gate blocks to Hp so gate slices stay lane-aligned.
    w_ih3 = _pad_to(params["w_ih"].reshape(3, H, E), (3, Hp, Ep))
    w_ih_p = jnp.transpose(w_ih3, (2, 0, 1)).reshape(Ep, 3 * Hp).astype(jnp.bfloat16)
    w_hh3 = _pad_to(params["w_hh"].reshape(3, H, H), (3, Hp, Hp))
    w_hh_p = jnp.transpose(w_hh3, (2, 0, 1)).reshape(Hp, 3 * Hp).astype(jnp.bfloat16)
    b_ih_p = _pad_to(params["b_ih"].reshape(3, H), (3, Hp)).reshape(1, 3 * Hp).astype(jnp.float32)
    b_hh_p = _pad_to(params["b_hh"].reshape(3, H), (3, Hp)).reshape(1, 3 * Hp).astype(jnp.float32)

    # Classifier weights (pre-transposed, padded, lane-dense V).
    w_c_p = _pad_to(params["w_c"], (Vp, Hp)).T.astype(jnp.bfloat16)   # (Hp, Vp)
    b_c_p = _pad_to(params["b_c"], (Vp,)).reshape(1, Vp).astype(jnp.float32)

    # --- kernel 1: GRU ---------------------------------------------------------------
    # Optional batch-chunk grid axis (lets v7x's 2 TensorCores split the recurrence).
    n_bchunks = 2 if (Bp % 16 == 0) else 1
    bb = Bp // n_bchunks

    hseq_bt, h_fin = pl.pallas_call(
        gru_kernel,
        out_shape=(jax.ShapeDtypeStruct((Bp, T, Hp), jnp.float32),
                   jax.ShapeDtypeStruct((Bp, Hp), jnp.float32)),
        grid=(n_bchunks,),
        in_specs=[
            pl.BlockSpec((T, bb, Ep), lambda i: (0, i, 0)),
            pl.BlockSpec((bb, Hp), lambda i: (i, 0)),
            pl.BlockSpec((Ep, 3 * Hp), lambda i: (0, 0)),
            pl.BlockSpec((Hp, 3 * Hp), lambda i: (0, 0)),
            pl.BlockSpec((1, 3 * Hp), lambda i: (0, 0)),
            pl.BlockSpec((1, 3 * Hp), lambda i: (0, 0)),
        ],
        out_specs=(
            pl.BlockSpec((bb, T, Hp), lambda i: (i, 0, 0)),
            pl.BlockSpec((bb, Hp), lambda i: (i, 0)),
        ),
        compiler_params=pltpu.CompilerParams(dimension_semantics=("parallel",)),
    )(x_tm, h0_p, w_ih_p, w_hh_p, b_ih_p, b_hh_p)

    # --- dropout mask (F.dropout default training=True -> applied unconditionally) ---
    # NOTE: without an explicit dropout_rng the mask is identical on every call.
    if dropout_rng is None:
        dropout_rng = jax.random.PRNGKey(0)
    keep = jax.random.bernoulli(dropout_rng, 0.5, (R, Hp))
    mask = keep.astype(jnp.float32) * 2.0             # {0., 2.}  (scale = 1/(1-p))

    # --- kernel 2: tiled dropout + classifier -----------------------------------------
    hseq_flat = hseq_bt.reshape(R, Hp)                # batch-major rows: free reshape
    tm = _pick_tile(R, (512, 256, 128, 64, 32, 16, 8))
    tn = _pick_tile(Vp, (512, 256, 128))

    logits_flat = pl.pallas_call(
        dropout_classifier_kernel,
        out_shape=jax.ShapeDtypeStruct((R, Vp), jnp.float32),
        grid=(R // tm, Vp // tn),
        in_specs=[
            pl.BlockSpec((tm, Hp), lambda i, j: (i, 0)),
            pl.BlockSpec((tm, Hp), lambda i, j: (i, 0)),
            pl.BlockSpec((Hp, tn), lambda i, j: (0, j)),
            pl.BlockSpec((1, tn), lambda i, j: (0, j)),
        ],
        out_specs=pl.BlockSpec((tm, tn), lambda i, j: (i, j)),
        compiler_params=pltpu.CompilerParams(
            dimension_semantics=("parallel", "parallel")),
    )(hseq_flat, mask, w_c_p, b_c_p)

    # Batch-major rows -> (B, T, V) with a free reshape + slice (no HBM transpose pass).
    output = logits_flat.reshape(Bp, T, Vp)[:B, :, :V]
    hidden_out = h_fin[:B, :H][None, :, :]            # (num_layers=1, B, H)

    if use_softmax:
        output = jax.nn.softmax(output, axis=2)       # glue (not fused into the epilogue)
    return output, hidden_out


if __name__ == "__main__":
    # Small deterministic shapes consistent with the module (batch_size=15, hidden_size=10).
    vocab_size, embedding_size, hidden_size, num_layers = 30, 12, 10, 1
    B, T = 15, 8

    key = jax.random.PRNGKey(0)
    pkey, ikey, dkey = jax.random.split(key, 3)
    params = init_generator_params(pkey, vocab_size, embedding_size, hidden_size)
    inputs = jax.random.randint(ikey, (B, T), 0, vocab_size, dtype=jnp.int32)

    output, hidden = generator_forward(params, inputs, use_softmax=False, dropout_rng=dkey)
    output = jax.block_until_ready(output)
    hidden = jax.block_until_ready(hidden)

    assert output.shape == (B, T, vocab_size)
    assert hidden.shape == (num_layers, B, hidden_size)
    assert bool(jnp.all(jnp.isfinite(output)))
    print("KERNEL_OK")
</pallas_src>

<mosaic_0001>
module attributes {stable_mosaic.version = 11 : i64} {
  func.func @gru_kernel(%arg0: i32, %arg1: memref<8x8x128xf32, #tpu.memory_space<vmem>>, %arg2: memref<8x128xf32, #tpu.memory_space<vmem>>, %arg3: memref<128x384xbf16, #tpu.memory_space<vmem>>, %arg4: memref<128x384xbf16, #tpu.memory_space<vmem>>, %arg5: memref<1x384xf32, #tpu.memory_space<vmem>>, %arg6: memref<1x384xf32, #tpu.memory_space<vmem>>, %arg7: memref<8x8x128xf32, #tpu.memory_space<vmem>>, %arg8: memref<8x128xf32, #tpu.memory_space<vmem>>) attributes {dimension_semantics = [#tpu.dimension_semantics<parallel>], iteration_bounds = array<i64: 2>, scalar_prefetch = 0 : i64, scratch_operands = 0 : i64, tpu.core_type = #tpu.core_type<tc>, window_params = [{transform_indices = @transform_0, window_bounds = array<i64: 8, 8, 128>}, {transform_indices = @transform_1, window_bounds = array<i64: 8, 128>}, {pipeline_mode = #tpu.pipeline_mode<synchronous>, transform_indices = @transform_2, window_bounds = array<i64: 128, 384>}, {pipeline_mode = #tpu.pipeline_mode<synchronous>, transform_indices = @transform_3, window_bounds = array<i64: 128, 384>}, {pipeline_mode = #tpu.pipeline_mode<synchronous>, transform_indices = @transform_4, window_bounds = array<i64: 1, 384>}, {pipeline_mode = #tpu.pipeline_mode<synchronous>, transform_indices = @transform_5, window_bounds = array<i64: 1, 384>}, {transform_indices = @transform_6, window_bounds = array<i64: 8, 8, 128>}, {transform_indices = @transform_7, window_bounds = array<i64: 8, 128>}]} {
    %c0 = arith.constant 0 : index
    %c0_0 = arith.constant 0 : index
    %0 = vector.load %arg3[%c0, %c0_0] : memref<128x384xbf16, #tpu.memory_space<vmem>>, vector<128x384xbf16>
    %c0_1 = arith.constant 0 : index
    %c0_2 = arith.constant 0 : index
    %1 = vector.load %arg4[%c0_1, %c0_2] : memref<128x384xbf16, #tpu.memory_space<vmem>>, vector<128x384xbf16>
    %c0_3 = arith.constant 0 : index
    %c0_4 = arith.constant 0 : index
    %2 = vector.load %arg5[%c0_3, %c0_4] : memref<1x384xf32, #tpu.memory_space<vmem>>, vector<1x384xf32>
    %c0_5 = arith.constant 0 : index
    %c0_6 = arith.constant 0 : index
    %3 = vector.load %arg6[%c0_5, %c0_6] : memref<1x384xf32, #tpu.memory_space<vmem>>, vector<1x384xf32>
    %c0_7 = arith.constant 0 : index
    %c0_8 = arith.constant 0 : index
    %c0_9 = arith.constant 0 : index
    %4 = vector.load %arg1[%c0_7, %c0_8, %c0_9] : memref<8x8x128xf32, #tpu.memory_space<vmem>>, vector<8x8x128xf32>
    %5 = vector.shape_cast %4 : vector<8x8x128xf32> to vector<64x128xf32>
    %6 = arith.truncf %5 : vector<64x128xf32> to vector<64x128xbf16>
    %cst = arith.constant dense<0.000000e+00> : vector<64x384xf32>
    %7 = tpu.matmul %6, %0, %cst {dimension_numbers = #tpu.dot_dimension_numbers<[1], [0], [0], [1], [0, 0, 1, 1], [], []>} : vector<64x128xbf16>, vector<128x384xbf16>, vector<64x384xf32> -> vector<64x384xf32>
    %8 = vector.broadcast %2 : vector<1x384xf32> to vector<64x384xf32>
    %9 = arith.addf %7, %8 : vector<64x384xf32>
    %c0_10 = arith.constant 0 : index
    %c0_11 = arith.constant 0 : index
    %10 = vector.load %arg2[%c0_10, %c0_11] : memref<8x128xf32, #tpu.memory_space<vmem>>, vector<8x128xf32>
    %11 = vector.extract_strided_slice %9 {offsets = [0, 0], sizes = [8, 384], strides = [1, 1]} : vector<64x384xf32> to vector<8x384xf32>
    %12 = arith.truncf %10 : vector<8x128xf32> to vector<8x128xbf16>
    %cst_12 = arith.constant dense<0.000000e+00> : vector<8x384xf32>
    %13 = tpu.matmul %12, %1, %cst_12 {dimension_numbers = #tpu.dot_dimension_numbers<[1], [0], [0], [1], [0, 0, 1, 1], [], []>} : vector<8x128xbf16>, vector<128x384xbf16>, vector<8x384xf32> -> vector<8x384xf32>
    %14 = vector.broadcast %3 : vector<1x384xf32> to vector<8x384xf32>
    %15 = arith.addf %13, %14 : vector<8x384xf32>
    %16 = vector.extract_strided_slice %11 {offsets = [0, 0], sizes = [8, 128], strides = [1, 1]} : vector<8x384xf32> to vector<8x128xf32>
    %17 = vector.extract_strided_slice %15 {offsets = [0, 0], sizes = [8, 128], strides = [1, 1]} : vector<8x384xf32> to vector<8x128xf32>
    %18 = arith.addf %16, %17 : vector<8x128xf32>
    %19 = arith.negf %18 : vector<8x128xf32>
    %20 = math.exp %19 : vector<8x128xf32>
    %cst_13 = arith.constant 1.000000e+00 : f32
    %21 = vector.broadcast %cst_13 : f32 to vector<8x128xf32>
    %22 = arith.addf %21, %20 : vector<8x128xf32>
    %23 = arith.divf %21, %22 : vector<8x128xf32>
    %24 = vector.extract_strided_slice %11 {offsets = [0, 128], sizes = [8, 128], strides = [1, 1]} : vector<8x384xf32> to vector<8x128xf32>
    %25 = vector.extract_strided_slice %15 {offsets = [0, 128], sizes = [8, 128], strides = [1, 1]} : vector<8x384xf32> to vector<8x128xf32>
    %26 = arith.addf %24, %25 : vector<8x128xf32>
    %27 = arith.negf %26 : vector<8x128xf32>
    %28 = math.exp %27 : vector<8x128xf32>
    %cst_14 = arith.constant 1.000000e+00 : f32
    %29 = vector.broadcast %cst_14 : f32 to vector<8x128xf32>
    %30 = arith.addf %29, %28 : vector<8x128xf32>
    %31 = arith.divf %29, %30 : vector<8x128xf32>
    %32 = vector.extract_strided_slice %11 {offsets = [0, 256], sizes = [8, 128], strides = [1, 1]} : vector<8x384xf32> to vector<8x128xf32>
    %33 = vector.extract_strided_slice %15 {offsets = [0, 256], sizes = [8, 128], strides = [1, 1]} : vector<8x384xf32> to vector<8x128xf32>
    %34 = arith.mulf %23, %33 : vector<8x128xf32>
    %35 = arith.addf %32, %34 : vector<8x128xf32>
    %36 = math.tanh %35 : vector<8x128xf32>
    %37 = arith.subf %10, %36 : vector<8x128xf32>
    %38 = arith.mulf %31, %37 : vector<8x128xf32>
    %39 = arith.addf %36, %38 : vector<8x128xf32>
    %c0_15 = arith.constant 0 : index
    %c0_16 = arith.constant 0 : index
    %c0_17 = arith.constant 0 : index
    %40 = vector.load %arg7[%c0_15, %c0_16, %c0_17] : memref<8x8x128xf32, #tpu.memory_space<vmem>>, vector<8x1x128xf32>
    %41 = vector.shape_cast %40 : vector<8x1x128xf32> to vector<8x128xf32>
    %42 = vector.shape_cast %39 : vector<8x128xf32> to vector<8x1x128xf32>
    tpu.vector_store %arg7[%c0_15, %c0_16, %c0_17], %42 {strides = array<i32>} : memref<8x8x128xf32, #tpu.memory_space<vmem>>, vector<8x1x128xf32>,
    %43 = vector.extract_strided_slice %9 {offsets = [8, 0], sizes = [8, 384], strides = [1, 1]} : vector<64x384xf32> to vector<8x384xf32>
    %44 = arith.truncf %39 : vector<8x128xf32> to vector<8x128xbf16>
    %cst_18 = arith.constant dense<0.000000e+00> : vector<8x384xf32>
    %45 = tpu.matmul %44, %1, %cst_18 {dimension_numbers = #tpu.dot_dimension_numbers<[1], [0], [0], [1], [0, 0, 1, 1], [], []>} : vector<8x128xbf16>, vector<128x384xbf16>, vector<8x384xf32> -> vector<8x384xf32>
    %46 = vector.broadcast %3 : vector<1x384xf32> to vector<8x384xf32>
    %47 = arith.addf %45, %46 : vector<8x384xf32>
    %48 = vector.extract_strided_slice %43 {offsets = [0, 0], sizes = [8, 128], strides = [1, 1]} : vector<8x384xf32> to vector<8x128xf32>
    %49 = vector.extract_strided_slice %47 {offsets = [0, 0], sizes = [8, 128], strides = [1, 1]} : vector<8x384xf32> to vector<8x128xf32>
    %50 = arith.addf %48, %49 : vector<8x128xf32>
    %51 = arith.negf %50 : vector<8x128xf32>
    %52 = math.exp %51 : vector<8x128xf32>
    %cst_19 = arith.constant 1.000000e+00 : f32
    %53 = vector.broadcast %cst_19 : f32 to vector<8x128xf32>
    %54 = arith.addf %53, %52 : vector<8x128xf32>
    %55 = arith.divf %53, %54 : vector<8x128xf32>
    %56 = vector.extract_strided_slice %43 {offsets = [0, 128], sizes = [8, 128], strides = [1, 1]} : vector<8x384xf32> to vector<8x128xf32>
    %57 = vector.extract_strided_slice %47 {offsets = [0, 128], sizes = [8, 128], strides = [1, 1]} : vector<8x384xf32> to vector<8x128xf32>
    %58 = arith.addf %56, %57 : vector<8x128xf32>
    %59 = arith.negf %58 : vector<8x128xf32>
    %60 = math.exp %59 : vector<8x128xf32>
    %cst_20 = arith.constant 1.000000e+00 : f32
    %61 = vector.broadcast %cst_20 : f32 to vector<8x128xf32>
    %62 = arith.addf %61, %60 : vector<8x128xf32>
    %63 = arith.divf %61, %62 : vector<8x128xf32>
    %64 = vector.extract_strided_slice %43 {offsets = [0, 256], sizes = [8, 128], strides = [1, 1]} : vector<8x384xf32> to vector<8x128xf32>
    %65 = vector.extract_strided_slice %47 {offsets = [0, 256], sizes = [8, 128], strides = [1, 1]} : vector<8x384xf32> to vector<8x128xf32>
    %66 = arith.mulf %55, %65 : vector<8x128xf32>
    %67 = arith.addf %64, %66 : vector<8x128xf32>
    %68 = math.tanh %67 : vector<8x128xf32>
    %69 = arith.subf %39, %68 : vector<8x128xf32>
    %70 = arith.mulf %63, %69 : vector<8x128xf32>
    %71 = arith.addf %68, %70 : vector<8x128xf32>
    %c0_21 = arith.constant 0 : index
    %c1 = arith.constant 1 : index
    %c0_22 = arith.constant 0 : index
    %72 = vector.load %arg7[%c0_21, %c1, %c0_22] : memref<8x8x128xf32, #tpu.memory_space<vmem>>, vector<8x1x128xf32>
    %73 = vector.shape_cast %72 : vector<8x1x128xf32> to vector<8x128xf32>
    %74 = vector.shape_cast %71 : vector<8x128xf32> to vector<8x1x128xf32>
    tpu.vector_store %arg7[%c0_21, %c1, %c0_22], %74 {strides = array<i32>} : memref<8x8x128xf32, #tpu.memory_space<vmem>>, vector<8x1x128xf32>,
    %75 = vector.extract_strided_slice %9 {offsets = [16, 0], sizes = [8, 384], strides = [1, 1]} : vector<64x384xf32> to vector<8x384xf32>
    %76 = arith.truncf %71 : vector<8x128xf32> to vector<8x128xbf16>
    %cst_23 = arith.constant dense<0.000000e+00> : vector<8x384xf32>
    %77 = tpu.matmul %76, %1, %cst_23 {dimension_numbers = #tpu.dot_dimension_numbers<[1], [0], [0], [1], [0, 0, 1, 1], [], []>} : vector<8x128xbf16>, vector<128x384xbf16>, vector<8x384xf32> -> vector<8x384xf32>
    %78 = vector.broadcast %3 : vector<1x384xf32> to vector<8x384xf32>
    %79 = arith.addf %77, %78 : vector<8x384xf32>
    %80 = vector.extract_strided_slice %75 {offsets = [0, 0], sizes = [8, 128], strides = [1, 1]} : vector<8x384xf32> to vector<8x128xf32>
    %81 = vector.extract_strided_slice %79 {offsets = [0, 0], sizes = [8, 128], strides = [1, 1]} : vector<8x384xf32> to vector<8x128xf32>
    %82 = arith.addf %80, %81 : vector<8x128xf32>
    %83 = arith.negf %82 : vector<8x128xf32>
    %84 = math.exp %83 : vector<8x128xf32>
    %cst_24 = arith.constant 1.000000e+00 : f32
    %85 = vector.broadcast %cst_24 : f32 to vector<8x128xf32>
    %86 = arith.addf %85, %84 : vector<8x128xf32>
    %87 = arith.divf %85, %86 : vector<8x128xf32>
    %88 = vector.extract_strided_slice %75 {offsets = [0, 128], sizes = [8, 128], strides = [1, 1]} : vector<8x384xf32> to vector<8x128xf32>
    %89 = vector.extract_strided_slice %79 {offsets = [0, 128], sizes = [8, 128], strides = [1, 1]} : vector<8x384xf32> to vector<8x128xf32>
    %90 = arith.addf %88, %89 : vector<8x128xf32>
    %91 = arith.negf %90 : vector<8x128xf32>
    %92 = math.exp %91 : vector<8x128xf32>
    %cst_25 = arith.constant 1.000000e+00 : f32
    %93 = vector.broadcast %cst_25 : f32 to vector<8x128xf32>
    %94 = arith.addf %93, %92 : vector<8x128xf32>
    %95 = arith.divf %93, %94 : vector<8x128xf32>
    %96 = vector.extract_strided_slice %75 {offsets = [0, 256], sizes = [8, 128], strides = [1, 1]} : vector<8x384xf32> to vector<8x128xf32>
    %97 = vector.extract_strided_slice %79 {offsets = [0, 256], sizes = [8, 128], strides = [1, 1]} : vector<8x384xf32> to vector<8x128xf32>
    %98 = arith.mulf %87, %97 : vector<8x128xf32>
    %99 = arith.addf %96, %98 : vector<8x128xf32>
    %100 = math.tanh %99 : vector<8x128xf32>
    %101 = arith.subf %71, %100 : vector<8x128xf32>
    %102 = arith.mulf %95, %101 : vector<8x128xf32>
    %103 = arith.addf %100, %102 : vector<8x128xf32>
    %c0_26 = arith.constant 0 : index
    %c2 = arith.constant 2 : index
    %c0_27 = arith.constant 0 : index
    %104 = vector.load %arg7[%c0_26, %c2, %c0_27] : memref<8x8x128xf32, #tpu.memory_space<vmem>>, vector<8x1x128xf32>
    %105 = vector.shape_cast %104 : vector<8x1x128xf32> to vector<8x128xf32>
    %106 = vector.shape_cast %103 : vector<8x128xf32> to vector<8x1x128xf32>
    tpu.vector_store %arg7[%c0_26, %c2, %c0_27], %106 {strides = array<i32>} : memref<8x8x128xf32, #tpu.memory_space<vmem>>, vector<8x1x128xf32>,
    %107 = vector.extract_strided_slice %9 {offsets = [24, 0], sizes = [8, 384], strides = [1, 1]} : vector<64x384xf32> to vector<8x384xf32>
    %108 = arith.truncf %103 : vector<8x128xf32> to vector<8x128xbf16>
    %cst_28 = arith.constant dense<0.000000e+00> : vector<8x384xf32>
    %109 = tpu.matmul %108, %1, %cst_28 {dimension_numbers = #tpu.dot_dimension_numbers<[1], [0], [0], [1], [0, 0, 1, 1], [], []>} : vector<8x128xbf16>, vector<128x384xbf16>, vector<8x384xf32> -> vector<8x384xf32>
    %110 = vector.broadcast %3 : vector<1x384xf32> to vector<8x384xf32>
    %111 = arith.addf %109, %110 : vector<8x384xf32>
    %112 = vector.extract_strided_slice %107 {offsets = [0, 0], sizes = [8, 128], strides = [1, 1]} : vector<8x384xf32> to vector<8x128xf32>
    %113 = vector.extract_strided_slice %111 {offsets = [0, 0], sizes = [8, 128], strides = [1, 1]} : vector<8x384xf32> to vector<8x128xf32>
    %114 = arith.addf %112, %113 : vector<8x128xf32>
    %115 = arith.negf %114 : vector<8x128xf32>
    %116 = math.exp %115 : vector<8x128xf32>
    %cst_29 = arith.constant 1.000000e+00 : f32
    %117 = vector.broadcast %cst_29 : f32 to vector<8x128xf32>
    %118 = arith.addf %117, %116 : vector<8x128xf32>
    %119 = arith.divf %117, %118 : vector<8x128xf32>
    %120 = vector.extract_strided_slice %107 {offsets = [0, 128], sizes = [8, 128], strides = [1, 1]} : vector<8x384xf32> to vector<8x128xf32>
    %121 = vector.extract_strided_slice %111 {offsets = [0, 128], sizes = [8, 128], strides = [1, 1]} : vector<8x384xf32> to vector<8x128xf32>
    %122 = arith.addf %120, %121 : vector<8x128xf32>
    %123 = arith.negf %122 : vector<8x128xf32>
    %124 = math.exp %123 : vector<8x128xf32>
    %cst_30 = arith.constant 1.000000e+00 : f32
    %125 = vector.broadcast %cst_30 : f32 to vector<8x128xf32>
    %126 = arith.addf %125, %124 : vector<8x128xf32>
    %127 = arith.divf %125, %126 : vector<8x128xf32>
    %128 = vector.extract_strided_slice %107 {offsets = [0, 256], sizes = [8, 128], strides = [1, 1]} : vector<8x384xf32> to vector<8x128xf32>
    %129 = vector.extract_strided_slice %111 {offsets = [0, 256], sizes = [8, 128], strides = [1, 1]} : vector<8x384xf32> to vector<8x128xf32>
    %130 = arith.mulf %119, %129 : vector<8x128xf32>
    %131 = arith.addf %128, %130 : vector<8x128xf32>
    %132 = math.tanh %131 : vector<8x128xf32>
    %133 = arith.subf %103, %132 : vector<8x128xf32>
    %134 = arith.mulf %127, %133 : vector<8x128xf32>
    %135 = arith.addf %132, %134 : vector<8x128xf32>
    %c0_31 = arith.constant 0 : index
    %c3 = arith.constant 3 : index
    %c0_32 = arith.constant 0 : index
    %136 = vector.load %arg7[%c0_31, %c3, %c0_32] : memref<8x8x128xf32, #tpu.memory_space<vmem>>, vector<8x1x128xf32>
    %137 = vector.shape_cast %136 : vector<8x1x128xf32> to vector<8x128xf32>
    %138 = vector.shape_cast %135 : vector<8x128xf32> to vector<8x1x128xf32>
    tpu.vector_store %arg7[%c0_31, %c3, %c0_32], %138 {strides = array<i32>} : memref<8x8x128xf32, #tpu.memory_space<vmem>>, vector<8x1x128xf32>,
    %139 = vector.extract_strided_slice %9 {offsets = [32, 0], sizes = [8, 384], strides = [1, 1]} : vector<64x384xf32> to vector<8x384xf32>
    %140 = arith.truncf %135 : vector<8x128xf32> to vector<8x128xbf16>
    %cst_33 = arith.constant dense<0.000000e+00> : vector<8x384xf32>
    %141 = tpu.matmul %140, %1, %cst_33 {dimension_numbers = #tpu.dot_dimension_numbers<[1], [0], [0], [1], [0, 0, 1, 1], [], []>} : vector<8x128xbf16>, vector<128x384xbf16>, vector<8x384xf32> -> vector<8x384xf32>
    %142 = vector.broadcast %3 : vector<1x384xf32> to vector<8x384xf32>
    %143 = arith.addf %141, %142 : vector<8x384xf32>
    %144 = vector.extract_strided_slice %139 {offsets = [0, 0], sizes = [8, 128], strides = [1, 1]} : vector<8x384xf32> to vector<8x128xf32>
    %145 = vector.extract_strided_slice %143 {offsets = [0, 0], sizes = [8, 128], strides = [1, 1]} : vector<8x384xf32> to vector<8x128xf32>
    %146 = arith.addf %144, %145 : vector<8x128xf32>
    %147 = arith.negf %146 : vector<8x128xf32>
    %148 = math.exp %147 : vector<8x128xf32>
    %cst_34 = arith.constant 1.000000e+00 : f32
    %149 = vector.broadcast %cst_34 : f32 to vector<8x128xf32>
    %150 = arith.addf %149, %148 : vector<8x128xf32>
    %151 = arith.divf %149, %150 : vector<8x128xf32>
    %152 = vector.extract_strided_slice %139 {offsets = [0, 128], sizes = [8, 128], strides = [1, 1]} : vector<8x384xf32> to vector<8x128xf32>
    %153 = vector.extract_strided_slice %143 {offsets = [0, 128], sizes = [8, 128], strides = [1, 1]} : vector<8x384xf32> to vector<8x128xf32>
    %154 = arith.addf %152, %153 : vector<8x128xf32>
    %155 = arith.negf %154 : vector<8x128xf32>
    %156 = math.exp %155 : vector<8x128xf32>
    %cst_35 = arith.constant 1.000000e+00 : f32
    %157 = vector.broadcast %cst_35 : f32 to vector<8x128xf32>
    %158 = arith.addf %157, %156 : vector<8x128xf32>
    %159 = arith.divf %157, %158 : vector<8x128xf32>
    %160 = vector.extract_strided_slice %139 {offsets = [0, 256], sizes = [8, 128], strides = [1, 1]} : vector<8x384xf32> to vector<8x128xf32>
    %161 = vector.extract_strided_slice %143 {offsets = [0, 256], sizes = [8, 128], strides = [1, 1]} : vector<8x384xf32> to vector<8x128xf32>
    %162 = arith.mulf %151, %161 : vector<8x128xf32>
    %163 = arith.addf %160, %162 : vector<8x128xf32>
    %164 = math.tanh %163 : vector<8x128xf32>
    %165 = arith.subf %135, %164 : vector<8x128xf32>
    %166 = arith.mulf %159, %165 : vector<8x128xf32>
    %167 = arith.addf %164, %166 : vector<8x128xf32>
    %c0_36 = arith.constant 0 : index
    %c4 = arith.constant 4 : index
    %c0_37 = arith.constant 0 : index
    %168 = vector.load %arg7[%c0_36, %c4, %c0_37] : memref<8x8x128xf32, #tpu.memory_space<vmem>>, vector<8x1x128xf32>
    %169 = vector.shape_cast %168 : vector<8x1x128xf32> to vector<8x128xf32>
    %170 = vector.shape_cast %167 : vector<8x128xf32> to vector<8x1x128xf32>
    tpu.vector_store %arg7[%c0_36, %c4, %c0_37], %170 {strides = array<i32>} : memref<8x8x128xf32, #tpu.memory_space<vmem>>, vector<8x1x128xf32>,
    %171 = vector.extract_strided_slice %9 {offsets = [40, 0], sizes = [8, 384], strides = [1, 1]} : vector<64x384xf32> to vector<8x384xf32>
    %172 = arith.truncf %167 : vector<8x128xf32> to vector<8x128xbf16>
    %cst_38 = arith.constant dense<0.000000e+00> : vector<8x384xf32>
    %173 = tpu.matmul %172, %1, %cst_38 {dimension_numbers = #tpu.dot_dimension_numbers<[1], [0], [0], [1], [0, 0, 1, 1], [], []>} : vector<8x128xbf16>, vector<128x384xbf16>, vector<8x384xf32> -> vector<8x384xf32>
    %174 = vector.broadcast %3 : vector<1x384xf32> to vector<8x384xf32>
    %175 = arith.addf %173, %174 : vector<8x384xf32>
    %176 = vector.extract_strided_slice %171 {offsets = [0, 0], sizes = [8, 128], strides = [1, 1]} : vector<8x384xf32> to vector<8x128xf32>
    %177 = vector.extract_strided_slice %175 {offsets = [0, 0], sizes = [8, 128], strides = [1, 1]} : vector<8x384xf32> to vector<8x128xf32>
    %178 = arith.addf %176, %177 : vector<8x128xf32>
    %179 = arith.negf %178 : vector<8x128xf32>
    %180 = math.exp %179 : vector<8x128xf32>
    %cst_39 = arith.constant 1.000000e+00 : f32
    %181 = vector.broadcast %cst_39 : f32 to vector<8x128xf32>
    %182 = arith.addf %181, %180 : vector<8x128xf32>
    %183 = arith.divf %181, %182 : vector<8x128xf32>
    %184 = vector.extract_strided_slice %171 {offsets = [0, 128], sizes = [8, 128], strides = [1, 1]} : vector<8x384xf32> to vector<8x128xf32>
    %185 = vector.extract_strided_slice %175 {offsets = [0, 128], sizes = [8, 128], strides = [1, 1]} : vector<8x384xf32> to vector<8x128xf32>
    %186 = arith.addf %184, %185 : vector<8x128xf32>
    %187 = arith.negf %186 : vector<8x128xf32>
    %188 = math.exp %187 : vector<8x128xf32>
    %cst_40 = arith.constant 1.000000e+00 : f32
    %189 = vector.broadcast %cst_40 : f32 to vector<8x128xf32>
    %190 = arith.addf %189, %188 : vector<8x128xf32>
    %191 = arith.divf %189, %190 : vector<8x128xf32>
    %192 = vector.extract_strided_slice %171 {offsets = [0, 256], sizes = [8, 128], strides = [1, 1]} : vector<8x384xf32> to vector<8x128xf32>
    %193 = vector.extract_strided_slice %175 {offsets = [0, 256], sizes = [8, 128], strides = [1, 1]} : vector<8x384xf32> to vector<8x128xf32>
    %194 = arith.mulf %183, %193 : vector<8x128xf32>
    %195 = arith.addf %192, %194 : vector<8x128xf32>
    %196 = math.tanh %195 : vector<8x128xf32>
    %197 = arith.subf %167, %196 : vector<8x128xf32>
    %198 = arith.mulf %191, %197 : vector<8x128xf32>
    %199 = arith.addf %196, %198 : vector<8x128xf32>
    %c0_41 = arith.constant 0 : index
    %c5 = arith.constant 5 : index
    %c0_42 = arith.constant 0 : index
    %200 = vector.load %arg7[%c0_41, %c5, %c0_42] : memref<8x8x128xf32, #tpu.memory_space<vmem>>, vector<8x1x128xf32>
    %201 = vector.shape_cast %200 : vector<8x1x128xf32> to vector<8x128xf32>
    %202 = vector.shape_cast %199 : vector<8x128xf32> to vector<8x1x128xf32>
    tpu.vector_store %arg7[%c0_41, %c5, %c0_42], %202 {strides = array<i32>} : memref<8x8x128xf32, #tpu.memory_space<vmem>>, vector<8x1x128xf32>,
    %203 = vector.extract_strided_slice %9 {offsets = [48, 0], sizes = [8, 384], strides = [1, 1]} : vector<64x384xf32> to vector<8x384xf32>
    %204 = arith.truncf %199 : vector<8x128xf32> to vector<8x128xbf16>
    %cst_43 = arith.constant dense<0.000000e+00> : vector<8x384xf32>
    %205 = tpu.matmul %204, %1, %cst_43 {dimension_numbers = #tpu.dot_dimension_numbers<[1], [0], [0], [1], [0, 0, 1, 1], [], []>} : vector<8x128xbf16>, vector<128x384xbf16>, vector<8x384xf32> -> vector<8x384xf32>
    %206 = vector.broadcast %3 : vector<1x384xf32> to vector<8x384xf32>
    %207 = arith.addf %205, %206 : vector<8x384xf32>
    %208 = vector.extract_strided_slice %203 {offsets = [0, 0], sizes = [8, 128], strides = [1, 1]} : vector<8x384xf32> to vector<8x128xf32>
    %209 = vector.extract_strided_slice %207 {offsets = [0, 0], sizes = [8, 128], strides = [1, 1]} : vector<8x384xf32> to vector<8x128xf32>
    %210 = arith.addf %208, %209 : vector<8x128xf32>
    %211 = arith.negf %210 : vector<8x128xf32>
    %212 = math.exp %211 : vector<8x128xf32>
    %cst_44 = arith.constant 1.000000e+00 : f32
    %213 = vector.broadcast %cst_44 : f32 to vector<8x128xf32>
    %214 = arith.addf %213, %212 : vector<8x128xf32>
    %215 = arith.divf %213, %214 : vector<8x128xf32>
    %216 = vector.extract_strided_slice %203 {offsets = [0, 128], sizes = [8, 128], strides = [1, 1]} : vector<8x384xf32> to vector<8x128xf32>
    %217 = vector.extract_strided_slice %207 {offsets = [0, 128], sizes = [8, 128], strides = [1, 1]} : vector<8x384xf32> to vector<8x128xf32>
    %218 = arith.addf %216, %217 : vector<8x128xf32>
    %219 = arith.negf %218 : vector<8x128xf32>
    %220 = math.exp %219 : vector<8x128xf32>
    %cst_45 = arith.constant 1.000000e+00 : f32
    %221 = vector.broadcast %cst_45 : f32 to vector<8x128xf32>
    %222 = arith.addf %221, %220 : vector<8x128xf32>
    %223 = arith.divf %221, %222 : vector<8x128xf32>
    %224 = vector.extract_strided_slice %203 {offsets = [0, 256], sizes = [8, 128], strides = [1, 1]} : vector<8x384xf32> to vector<8x128xf32>
    %225 = vector.extract_strided_slice %207 {offsets = [0, 256], sizes = [8, 128], strides = [1, 1]} : vector<8x384xf32> to vector<8x128xf32>
    %226 = arith.mulf %215, %225 : vector<8x128xf32>
    %227 = arith.addf %224, %226 : vector<8x128xf32>
    %228 = math.tanh %227 : vector<8x128xf32>
    %229 = arith.subf %199, %228 : vector<8x128xf32>
    %230 = arith.mulf %223, %229 : vector<8x128xf32>
    %231 = arith.addf %228, %230 : vector<8x128xf32>
    %c0_46 = arith.constant 0 : index
    %c6 = arith.constant 6 : index
    %c0_47 = arith.constant 0 : index
    %232 = vector.load %arg7[%c0_46, %c6, %c0_47] : memref<8x8x128xf32, #tpu.memory_space<vmem>>, vector<8x1x128xf32>
    %233 = vector.shape_cast %232 : vector<8x1x128xf32> to vector<8x128xf32>
    %234 = vector.shape_cast %231 : vector<8x128xf32> to vector<8x1x128xf32>
    tpu.vector_store %arg7[%c0_46, %c6, %c0_47], %234 {strides = array<i32>} : memref<8x8x128xf32, #tpu.memory_space<vmem>>, vector<8x1x128xf32>,
    %235 = vector.extract_strided_slice %9 {offsets = [56, 0], sizes = [8, 384], strides = [1, 1]} : vector<64x384xf32> to vector<8x384xf32>
    %236 = arith.truncf %231 : vector<8x128xf32> to vector<8x128xbf16>
    %cst_48 = arith.constant dense<0.000000e+00> : vector<8x384xf32>
    %237 = tpu.matmul %236, %1, %cst_48 {dimension_numbers = #tpu.dot_dimension_numbers<[1], [0], [0], [1], [0, 0, 1, 1], [], []>} : vector<8x128xbf16>, vector<128x384xbf16>, vector<8x384xf32> -> vector<8x384xf32>
    %238 = vector.broadcast %3 : vector<1x384xf32> to vector<8x384xf32>
    %239 = arith.addf %237, %238 : vector<8x384xf32>
    %240 = vector.extract_strided_slice %235 {offsets = [0, 0], sizes = [8, 128], strides = [1, 1]} : vector<8x384xf32> to vector<8x128xf32>
    %241 = vector.extract_strided_slice %239 {offsets = [0, 0], sizes = [8, 128], strides = [1, 1]} : vector<8x384xf32> to vector<8x128xf32>
    %242 = arith.addf %240, %241 : vector<8x128xf32>
    %243 = arith.negf %242 : vector<8x128xf32>
    %244 = math.exp %243 : vector<8x128xf32>
    %cst_49 = arith.constant 1.000000e+00 : f32
    %245 = vector.broadcast %cst_49 : f32 to vector<8x128xf32>
    %246 = arith.addf %245, %244 : vector<8x128xf32>
    %247 = arith.divf %245, %246 : vector<8x128xf32>
    %248 = vector.extract_strided_slice %235 {offsets = [0, 128], sizes = [8, 128], strides = [1, 1]} : vector<8x384xf32> to vector<8x128xf32>
    %249 = vector.extract_strided_slice %239 {offsets = [0, 128], sizes = [8, 128], strides = [1, 1]} : vector<8x384xf32> to vector<8x128xf32>
    %250 = arith.addf %248, %249 : vector<8x128xf32>
    %251 = arith.negf %250 : vector<8x128xf32>
    %252 = math.exp %251 : vector<8x128xf32>
    %cst_50 = arith.constant 1.000000e+00 : f32
    %253 = vector.broadcast %cst_50 : f32 to vector<8x128xf32>
    %254 = arith.addf %253, %252 : vector<8x128xf32>
    %255 = arith.divf %253, %254 : vector<8x128xf32>
    %256 = vector.extract_strided_slice %235 {offsets = [0, 256], sizes = [8, 128], strides = [1, 1]} : vector<8x384xf32> to vector<8x128xf32>
    %257 = vector.extract_strided_slice %239 {offsets = [0, 256], sizes = [8, 128], strides = [1, 1]} : vector<8x384xf32> to vector<8x128xf32>
    %258 = arith.mulf %247, %257 : vector<8x128xf32>
    %259 = arith.addf %256, %258 : vector<8x128xf32>
    %260 = math.tanh %259 : vector<8x128xf32>
    %261 = arith.subf %231, %260 : vector<8x128xf32>
    %262 = arith.mulf %255, %261 : vector<8x128xf32>
    %263 = arith.addf %260, %262 : vector<8x128xf32>
    %c0_51 = arith.constant 0 : index
    %c7 = arith.constant 7 : index
    %c0_52 = arith.constant 0 : index
    %264 = vector.load %arg7[%c0_51, %c7, %c0_52] : memref<8x8x128xf32, #tpu.memory_space<vmem>>, vector<8x1x128xf32>
    %265 = vector.shape_cast %264 : vector<8x1x128xf32> to vector<8x128xf32>
    %266 = vector.shape_cast %263 : vector<8x128xf32> to vector<8x1x128xf32>
    tpu.vector_store %arg7[%c0_51, %c7, %c0_52], %266 {strides = array<i32>} : memref<8x8x128xf32, #tpu.memory_space<vmem>>, vector<8x1x128xf32>,
    %c0_53 = arith.constant 0 : index
    %c0_54 = arith.constant 0 : index
    %267 = vector.load %arg8[%c0_53, %c0_54] : memref<8x128xf32, #tpu.memory_space<vmem>>, vector<8x128xf32>
    tpu.vector_store %arg8[%c0_53, %c0_54], %263 {strides = array<i32>} : memref<8x128xf32, #tpu.memory_space<vmem>>, vector<8x128xf32>,
    return
  }
  func.func @transform_0(%arg0: i32) -> (i32, i32, i32) {
    %c0_i32 = arith.constant 0 : i32
    %c0_i32_0 = arith.constant 0 : i32
    %c0_i32_1 = arith.constant 0 : i32
    return %c0_i32, %arg0, %c0_i32_0 : i32, i32, i32
  }
  func.func @transform_1(%arg0: i32) -> (i32, i32) {
    %c0_i32 = arith.constant 0 : i32
    %c0_i32_0 = arith.constant 0 : i32
    return %arg0, %c0_i32 : i32, i32
  }
  func.func @transform_2(%arg0: i32) -> (i32, i32) {
    %c0_i32 = arith.constant 0 : i32
    %c0_i32_0 = arith.constant 0 : i32
    %c0_i32_1 = arith.constant 0 : i32
    return %c0_i32, %c0_i32_0 : i32, i32
  }
  func.func @transform_3(%arg0: i32) -> (i32, i32) {
    %c0_i32 = arith.constant 0 : i32
    %c0_i32_0 = arith.constant 0 : i32
    %c0_i32_1 = arith.constant 0 : i32
    return %c0_i32, %c0_i32_0 : i32, i32
  }
  func.func @transform_4(%arg0: i32) -> (i32, i32) {
    %c0_i32 = arith.constant 0 : i32
    %c0_i32_0 = arith.constant 0 : i32
    %c0_i32_1 = arith.constant 0 : i32
    return %c0_i32, %c0_i32_0 : i32, i32
  }
  func.func @transform_5(%arg0: i32) -> (i32, i32) {
    %c0_i32 = arith.constant 0 : i32
    %c0_i32_0 = arith.constant 0 : i32
    %c0_i32_1 = arith.constant 0 : i32
    return %c0_i32, %c0_i32_0 : i32, i32
  }
  func.func @transform_6(%arg0: i32) -> (i32, i32, i32) {
    %c0_i32 = arith.constant 0 : i32
    %c0_i32_0 = arith.constant 0 : i32
    %c0_i32_1 = arith.constant 0 : i32
    return %arg0, %c0_i32, %c0_i32_0 : i32, i32, i32
  }
  func.func @transform_7(%arg0: i32) -> (i32, i32) {
    %c0_i32 = arith.constant 0 : i32
    %c0_i32_0 = arith.constant 0 : i32
    return %arg0, %c0_i32 : i32, i32
  }
}

</mosaic_0001>

<bundles_post_ra>
// kernel: tpu_custom_call.1
= control target key start
LH: loop header
LB: loop body
LE: loop exit
PB: predicated region body
PF: predicated region fallthrough
CT: control target
= control target key end

     0   :  { %s3420_s0 = inlined_call_operand.hbm [shape: f32[8,16,128], index: 0, kind: input, shape index: {}]   ;;  %s3421_s1 = inlined_call_operand.hbm [shape: f32[16,128], index: 1, kind: input, shape index: {}]   ;;  %s3422_s2 = inlined_call_operand.hbm [shape: bf16[128,384], index: 2, kind: input, shape index: {}]   ;;  %s3423_s3 = inlined_call_operand.hbm [shape: bf16[128,384], index: 3, kind: input, shape index: {}]   ;;  %s3424_s4 = inlined_call_operand.vmem [shape: f32[1,384], index: 4, kind: input, shape index: {}]   ;;  %s3425_s5 = inlined_call_operand.hbm [shape: f32[1,384], index: 5, kind: input, shape index: {}]   ;;  %s3426_s6 = inlined_call_operand.hbm [shape: f32[16,8,128], index: 6, kind: output, shape index: {0}]   ;;  %s3427_s7 = inlined_call_operand.hbm [shape: f32[16,128], index: 7, kind: output, shape index: {1}]  }
   0x1   :  { %3433 = sst [smem:[#allocation30_spill]] %s3420_s0 }
   0x2   :  { %3434 = sst [smem:[#allocation31_spill]] %s3422_s2 }
   0x3   :  { %3435 = sst [smem:[#allocation32_spill]] %s3423_s3 }
   0x4   :  { %3436 = sst [smem:[#allocation33_spill]] %s3425_s5 }
   0x5   :  { %13 = vsyncpa [#allocation3], 0 }
   0x6   :  { %15 = vsyncpa [#allocation3 + $0x1], 0 }
   0x7   :  { %16 = vsyncpa [#allocation6], 0 }
   0x8   :  { %18 = vsyncpa [#allocation6 + $0x1], 0 }
   0x9   :  { %19 = vsyncpa [#allocation9], 0 }
   0xa   :  { %20 = vsyncpa [#allocation4], 0 }
   0xb   :  { %22 = vsyncpa [#allocation4 + $0x1], 0 }
   0xc   :  { %23 = vsyncpa [#allocation13], 0 }
   0xd   :  { %25 = vsyncpa [#allocation13 + $0x1], 0  ;;  %s2665_s24 = smov 0   ;;  %s2667_s25 = smov 0  }
   0xe   :  { %s2669_s26 = smov 0   ;;  %s2671_s27 = smov 0  }
   0xf LB: > { %3437 = sst [smem:[#allocation20_spill]] %s2609_s26  ;;  %s2686_s28 = sadd.s32 4294967295, %s2613_s27   ;;  %s2613_s27 = sphi %s2671_s27, %s3466_s27   ;;  %s2609_s26 = sphi %s2669_s26, %s3468_s26   ;;  %s2605_s25 = sphi %s2667_s25, %s3470_s25   ;;  %s2601_s24 = sphi %s2665_s24, %s3469_s24  }
  0x10   : > { %s1897_s29 = sadd.s32 4294967294, %s2613_s27   ;;  %p51_p0 = scmp.ne.s32.totalorder %s2605_s25, %s2601_s24 }
  0x11   : > { %p52_p1 = scmp.eq.s32.totalorder %s2686_s28, 0  ;;  %p185_p2 = scmp.eq.s32.totalorder %s2686_s28, 1 }
  0x12   : > { %p191_p3 = scmp.eq.s32.totalorder %s1897_s29, 1  ;;  %p1898_p5 = scmp.ge.s32.totalorder %s2613_s27, 1 }
  0x13   : > { %p2695_p4 = por %p52_p1, %p51_p0  ;;  %p224_p7 = scmp.lt.s32.totalorder %s2613_s27, 3 }
  0x14   : > { %p2700_p6 = por %p191_p3, %p51_p0  ;;  %s3441_s2 = sld [smem:[#allocation31_spill]] }
  0x15   : > { %p2708_p8 = pnand %p1898_p5, %p224_p7  ;;  %s2615_s13 = smov [#allocation7]  }
  0x16   : > { %s3439_s8 = scalar_select %p2700_p6, 1, 0 }
  0x17   : > { %p2199_p9 = pneg %p2708_p8  ;;  %s237_s14 = sshll.u32 %s2615_s13, 4  ;;  %s238_s14 = int_to_ptr.vmem [resolvable:$true] %s237_s14 }
  0x18   : > { %3440 = sst [smem:[#allocation21_spill]] %s3439_s8  ;;  %s2616_s19 = smov 192  }
  0x19   : > { %p2716_p10 = pnand %p2199_p9, %p52_p1  ;;  %s3444_s3 = sld [smem:[#allocation32_spill]] }
  0x1a   : > { %s235_s11 = sshll.u32 %s3441_s2, 4  ;;  %s2617_s20 = smov 12   ;;  %s236_s11 = int_to_ptr.hbm [resolvable:$true] %s235_s11 }
  0x1b   : > { %2202 = dma.hbm_to_vmem [thread:$0]  (!%p2716_p10), %s236_s11, 3072, %s238_s14, [#allocation6], %s2616_s19, %s2616_s19, %s2617_s20  }
  0x1c   : > { %s2618_s21 = smov [#allocation8]   ;;  %s3445_s5 = sld [smem:[#allocation33_spill]] }
  0x1d   : > { %s251_s22 = sshll.u32 %s2618_s21, 4  ;;  %s2619_s10 = smov [#allocation10]   ;;  %s252_s22 = int_to_ptr.vmem [resolvable:$true] %s251_s22 }
  0x1e   : > { %s269_s13 = sshll.u32 %s2619_s10, 4  ;;  %s2732_s11 = sadd.s32 1, %s2613_s27   ;;  %s270_s13 = int_to_ptr.vmem [resolvable:$true] %s269_s13 }
  0x1f   : > { %s249_s18 = sshll.u32 %s3444_s3, 4  ;;  %3446 = sst [smem:[#allocation22_spill]] %s2732_s11  ;;  %s250_s18 = int_to_ptr.hbm [resolvable:$true] %s249_s18 }
  0x20   : > { %2205 = dma.hbm_to_vmem [thread:$0]  (!%p2716_p10), %s250_s18, 3072, %s252_s22, [#allocation9], %s2616_s19, %s2616_s19, %s2617_s20  }
  0x21   : > { %s35_s14 = ssub.s32 %s2613_s27, %s2732_s11  ;;  %s38_s16 = sadd.s32 1, %s2609_s26 }
  0x22   : > { %s267_s9 = sshll.u32 %s3445_s5, 4  ;;  %p36_p12 = scmp.eq.s32.totalorder %s35_s14, 0  ;;  %s268_s9 = int_to_ptr.hbm [resolvable:$true] %s267_s9 }
  0x23   : > { %2208 = dma.hbm_to_vmem [thread:$0]  (!%p2716_p10), %s268_s9, 48, %s270_s13, [#allocation9]  }
  0x24   : > { %p45_p13 = scmp.ne.s32.totalorder %s2609_s26, %s2605_s25  ;;  %p46_p0 = scmp.eq.s32.totalorder %s2613_s27, 0 }
  0x25   : > { %p2226_p3 = scmp.lt.s32.totalorder %s2613_s27, 2  ;;  %s2753_s19 = sand.u32 1, %s2609_s26  }
  0x26   : > { %s2744_s17 = scalar_select %p36_p12, %s2609_s26, %s38_s16  }
  0x27   : > { %p47_p5 = por %p46_p0, %p45_p13  ;;  %p2748_p7 = por %p185_p2, %p45_p13 }
  0x28   : > { %3447 = sst [smem:[#allocation23_spill]] %s2744_s17  ;;  %s3428_s15 = sshll.u32 %s2613_s27, 3 }
  0x29   : > { %s1903_s20 = sshll.u32 %s2753_s19, 6  ;;  %s3449_s0 = sld [smem:[#allocation30_spill]] }
  0x2a   : > { %s284_s9 = scalar_lea.vmem [#allocation2], %s1903_s20  ;;  %p2764_p2 = pnand %p2226_p3, %p47_p5 }
  0x2b   : > { %s291_s10 = sshll.u32 %s284_s9, 4  ;;  %s301_s14 = sand.u32 1, %s2613_s27   ;;  %s292_s10 = int_to_ptr.vmem [resolvable:$true] %s291_s10 }
  0x2c   : > { %s281_s16 = scalar_lea.sflag [#allocation3], %s2753_s19  ;;  %p2447_p10 = pneg %p2764_p2 }
  0x2f   : > { %s288_s23 = scalar_lea.hbm %s3449_s0, %s3428_s15  ;;  %s2450_s22 = scalar_lea.hbm %s3449_s0, 128 }
  0x30   : > { %s289_s29 = sshll.u32 %s288_s23, 4  ;;  %s290_s29 = int_to_ptr.hbm [resolvable:$true] %s289_s29 }
  0x31   : > { %s2443_s2 = sshra.s32 %s290_s29, 4  ;;  %s2444_s2 = int_to_ptr.hbm [resolvable:$true] %s2443_s2 }
  0x32   : > { %s2445_s3 = scalar_lea.hbm %s2444_s2, 64  ;;  %p2451_p0 = scmp.lt.s32.totalorder %s2444_s2, %s3449_s0 }
  0x33   : > { %p2446_p9 = scmp.ne.s32.totalorder %s2444_s2, %s2445_s3  ;;  %p2452_p3 = scmp.lt.s32.totalorder %s2450_s22, %s2445_s3 }
  0x35   : > { %p2448_p12 = pnand %p2447_p10, %p2446_p9  ;;  %p2453_p5 = por %p2452_p3, %p2451_p0 }
  0x37   : > { %p2449_p13 = pneg %p2448_p12 }
  0x39   : > { %p2454_p11 = pnand %p2453_p5, %p2449_p13 }
  0x3b   : > { %2457 = shalt.err (!%p2454_p11)
}
  0x3c   : > { %s2620_s15 = smov 256   ;;  %s2621_s5 = smov 128  }
  0x3d   : > { %s2622_s17 = smov 8   ;;  %s1905_s26 = sshll.u32 %s2753_s19, 3 }
  0x3e   : > { %2212 = dma.hbm_to_vmem [thread:$0]  (!%p2764_p2), %s290_s29, 1024, %s292_s10, %s281_s16, %s2620_s15, %s2621_s5, %s2622_s17  }
  0x3f   : > { %s3451_s20 = sshll.u32 %s2613_s27, 3  ;;  %s305_s3 = scalar_lea.vmem [#allocation5], %s1905_s26 }
  0x40   : > { %s309_s23 = scalar_lea.hbm %s3421_s1, %s3451_s20  ;;  %s313_s22 = sshll.u32 %s305_s3, 4  ;;  %s314_s22 = int_to_ptr.vmem [resolvable:$true] %s313_s22 }
  0x41   : > { %s311_s2 = sshll.u32 %s309_s23, 4  ;;  %s302_s9 = scalar_lea.sflag [#allocation6], %s301_s14  ;;  %s312_s2 = int_to_ptr.hbm [resolvable:$true] %s311_s2 }
  0x42   : > { %s2473_s0 = sshra.s32 %s312_s2, 4  ;;  %s2480_s19 = scalar_lea.hbm %s3421_s1, 16  ;;  %s2474_s0 = int_to_ptr.hbm [resolvable:$true] %s2473_s0 }
  0x43   : > { %s2475_s8 = scalar_lea.hbm %s2474_s0, 8  ;;  %p2481_p13 = scmp.lt.s32.totalorder %s2474_s0, %s3421_s1 }
  0x44   : > { %p2476_p11 = scmp.ne.s32.totalorder %s2474_s0, %s2475_s8  ;;  %p2482_p0 = scmp.lt.s32.totalorder %s2480_s19, %s2475_s8 }
  0x46   : > { %p2478_p9 = pnand %p2476_p11, %p2447_p10  ;;  %p2483_p3 = por %p2482_p0, %p2481_p13 }
  0x48   : > { %p2479_p12 = pneg %p2478_p9 }
  0x4a   : > { %p2484_p5 = pnand %p2483_p3, %p2479_p12 }
  0x4c   : > { %2487 = shalt.err (!%p2484_p5)
}
  0x4d   : > { %2215 = dma.hbm_to_vmem [thread:$0]  (!%p2764_p2), %s312_s2, 128, %s314_s22, %s302_s9  }
  0x4e   : > { %322 = sbr.rel (%p2708_p8) target bundleno = 1619 (0x653), region = 44 }
  0x53   : > { %s2803_s26 = sand.u32 1, %s2605_s25  }
  0x54   : > { %s1908_s29 = sshll.u32 %s2803_s26, 6  ;;  %s325_s10 = scalar_lea.sflag [#allocation3], %s2803_s26 }
  0x55   : > { %s2809_s0 = scalar_lea.vmem [#allocation2], %s1908_s29 }
  0x56   : > { %2576 = dma.done.wait (%p2695_p4), %s325_s10, 1024  }
  0x57   : > { %2578 = vsyncadd (%p2695_p4), %s325_s10, 4294966272  ;;  %s334_s8 = sand.u32 1, %s2686_s28   ;;  %s1909_s12 = sshll.u32 %s2803_s26, 3 }
  0x58   : > { %s335_s13 = scalar_lea.sflag [#allocation6], %s334_s8  ;;  %s2819_s14 = scalar_lea.vmem [#allocation5], %s1909_s12 }
  0x59   : > { %2580 = dma.done.wait (%p2695_p4), %s335_s13, 128  }
  0x5a   : > { %2582 = vsyncadd (%p2695_p4), %s335_s13, 4294967168 }
  0x5b   : > { %2584 = dma.done.wait (%p52_p1), [#allocation6], 3072  }
  0x5c   : > { %2586 = vsyncadd (%p52_p1), [#allocation6], 4294964224 }
  0x5d   : > { %2588 = dma.done.wait (%p52_p1), [#allocation9], 3120  }
  0x5e   : > { %2590 = vsyncadd (%p52_p1), [#allocation9], 4294964176  ;;  %v2001_v0 = vld [vmem:[#allocation7 + $0xa8] sm:$0xf]  ;;  %v2152_v1 = vld [vmem:[#allocation7 + $0xb0] sm:$0xf0] }
  0x5f   : > { %v2097_v2 = vld [vmem:[#allocation8 + $0xa8] sm:$0xf]  ;;  %v2002_v3 = vor.u32 %v2152_v1, %v2001_v0  ;;  %v2176_v4 = vld [vmem:[#allocation8 + $0xb0] sm:$0xf0]  ;;  %v1989_v5 = vld [vmem:[#allocation7 + $0x90] sm:$0xf] }
  0x60   : > { %v2149_v6 = vld [vmem:[#allocation7 + $0x98] sm:$0xf0]  ;;  %v2833_v7 = vor.u32 %v2176_v4, %v2097_v2  ;;  %v2085_v8 = vld [vmem:[#allocation8 + $0x90] sm:$0xf]  ;;  %v1977_v12 = vld [vmem:[#allocation7 + $0x78] sm:$0xf] }
  0x61   : > { %v2173_v9 = vld [vmem:[#allocation8 + $0x98] sm:$0xf0]  ;;  %609 = vmatpush.bf16.msra.mxu0 %v2002_v3  ;;  %v1990_v10 = vor.u32 %v2149_v6, %v1989_v5  ;;  %v2146_v13 = vld [vmem:[#allocation7 + $0x80] sm:$0xf0]  ;;  %v2073_v14 = vld [vmem:[#allocation8 + $0x78] sm:$0xf] }
  0x62   : > { %833 = vmatpush.bf16.msra.mxu3 %v2833_v7  ;;  %v2836_v11 = vor.u32 %v2173_v9, %v2085_v8  ;;  %v2170_v15 = vld [vmem:[#allocation8 + $0x80] sm:$0xf0]  ;;  %v1978_v16 = vor.u32 %v2146_v13, %v1977_v12  ;;  %v1965_v18 = vld [vmem:[#allocation7 + $0x60] sm:$0xf]  ;;  %v2143_v19 = vld [vmem:[#allocation7 + $0x68] sm:$0xf0] }
  0x63   : > { %v2839_v17 = vor.u32 %v2170_v15, %v2073_v14  ;;  %v2061_v20 = vld [vmem:[#allocation8 + $0x60] sm:$0xf]  ;;  %v2167_v21 = vld [vmem:[#allocation8 + $0x68] sm:$0xf0]  ;;  %v1966_v22 = vor.u32 %v2143_v19, %v1965_v18  ;;  %v1953_v24 = vld [vmem:[#allocation7 + $0x48] sm:$0xf] }
  0x64   : > { %v2842_v23 = vor.u32 %v2167_v21, %v2061_v20  ;;  %v2140_v25 = vld [vmem:[#allocation7 + $0x50] sm:$0xf0]  ;;  %v2049_v26 = vld [vmem:[#allocation8 + $0x48] sm:$0xf]  ;;  %v2151_v28 = vld [vmem:[#allocation7 + $0xac] sm:$0xf] }
  0x65   : > { %610 = vmatpush.bf16.msra.mxu0 %v1990_v10  ;;  %v2164_v27 = vld [vmem:[#allocation8 + $0x50] sm:$0xf0]  ;;  %v2003_v29 = vld [vmem:[#allocation7 + $0xb4] sm:$0xf0]  ;;  %v1954_v30 = vor.u32 %v2140_v25, %v1953_v24  ;;  %v1991_v33 = vld [vmem:[#allocation7 + $0x9c] sm:$0xf0] }
  0x66   : > { %834 = vmatpush.bf16.msra.mxu3 %v2836_v11  ;;  %v2006_v31 = vor.u32 %v2151_v28, %v2003_v29  ;;  %v2148_v32 = vld [vmem:[#allocation7 + $0x94] sm:$0xf]  ;;  %v2845_v34 = vor.u32 %v2164_v27, %v2049_v26  ;;  %v1941_v35 = vld [vmem:[#allocation7 + $0x30] sm:$0xf]  ;;  %v2137_v36 = vld [vmem:[#allocation7 + $0x38] sm:$0xf0] }
  0x67   : > { %v2037_v37 = vld [vmem:[#allocation8 + $0x30] sm:$0xf]  ;;  %v2161_v38 = vld [vmem:[#allocation8 + $0x38] sm:$0xf0]  ;;  %v1994_v39 = vor.u32 %v2148_v32, %v1991_v33  ;;  %v1979_v41 = vld [vmem:[#allocation7 + $0x84] sm:$0xf0]  ;;  %v1942_v42 = vor.u32 %v2137_v36, %v1941_v35 }
  0x68   : > { %638 = vmatpush.bf16.msra.mxu1 %v2006_v31  ;;  %v2145_v40 = vld [vmem:[#allocation7 + $0x7c] sm:$0xf]  ;;  %v2848_v43 = vor.u32 %v2161_v38, %v2037_v37  ;;  %v1929_v44 = vld [vmem:[#allocation7 + $0x18] sm:$0xf]  ;;  %v2134_v45 = vld [vmem:[#allocation7 + $0x20] sm:$0xf0] }
  0x69   : > { %611 = vmatpush.bf16.msra.mxu0 %v1978_v16  ;;  %v2025_v46 = vld [vmem:[#allocation8 + $0x18] sm:$0xf]  ;;  %v2158_v47 = vld [vmem:[#allocation8 + $0x20] sm:$0xf0]  ;;  %v1982_v48 = vor.u32 %v2145_v40, %v1979_v41  ;;  %v2009_v49 = vld [vmem:[#allocation7 + $0xb0] sm:$0xf]  ;;  %v1930_v53 = vor.u32 %v2134_v45, %v1929_v44 }
  0x6a   : > { %835 = vmatpush.bf16.msra.mxu3 %v2839_v17  ;;  %v2142_v50 = vld [vmem:[#allocation7 + $0x64] sm:$0xf]  ;;  %v1967_v51 = vld [vmem:[#allocation7 + $0x6c] sm:$0xf0]  ;;  %v2153_v52 = vld [vmem:[#allocation7 + $0xb8] sm:$0xf0]  ;;  %v2851_v58 = vor.u32 %v2158_v47, %v2025_v46 }
  0x6b   : > { %v1917_v54 = vld [vmem:[#allocation7] sm:$0xf]  ;;  %v2131_v55 = vld [vmem:[#allocation7 + $0x8] sm:$0xf0]  ;;  %v2010_v57 = vor.u32 %v2153_v52, %v2009_v49  ;;  %v2099_v61 = vld [vmem:[#allocation8 + $0xb4] sm:$0xf0]  ;;  %v1970_v0 = vor.u32 %v2142_v50, %v1967_v51 }
  0x6c   : > { %639 = vmatpush.bf16.msra.mxu1 %v1994_v39  ;;  %v2013_v56 = vld [vmem:[#allocation8] sm:$0xf]  ;;  %v2155_v59 = vld [vmem:[#allocation8 + $0x8] sm:$0xf0]  ;;  %v2105_v62 = vld [vmem:[#allocation8 + $0xb0] sm:$0xf]  ;;  %v1918_v5 = vor.u32 %v2131_v55, %v1917_v54 }
  0x6d   : > { %612 = vmatpush.bf16.msra.mxu0 %v1966_v22  ;;  %v2175_v60 = vld [vmem:[#allocation8 + $0xac] sm:$0xf]  ;;  %v2177_v63 = vld [vmem:[#allocation8 + $0xb8] sm:$0xf0]  ;;  %667 = vmatpush.bf16.msra.mxu2 %v2010_v57  ;;  %v1997_v1 = vld [vmem:[#allocation7 + $0x98] sm:$0xf]  ;;  %v2856_v10 = vor.u32 %v2155_v59, %v2013_v56 }
  0x6e   : > { %836 = vmatpush.bf16.msra.mxu3 %v2842_v23  ;;  %v2139_v2 = vld [vmem:[#allocation7 + $0x4c] sm:$0xf]  ;;  %v1955_v3 = vld [vmem:[#allocation7 + $0x54] sm:$0xf0]  ;;  %v2150_v4 = vld [vmem:[#allocation7 + $0xa0] sm:$0xf0]  ;;  %v2861_v13 = vor.u32 %v2177_v63, %v2105_v62  ;;  %v2863_v16 = vor.u32 %v2175_v60, %v2099_v61 }
  0x6f   : > { %v462_v6 = vld [vmem:[%s2809_s0] sm:$0xff]  ;;  %v463_v8 = vld [vmem:[%s2809_s0 + $0x8] sm:$0xff]  ;;  %v1998_v9 = vor.u32 %v2150_v4, %v1997_v1  ;;  %v2174_v18 = vld [vmem:[#allocation8 + $0xa0] sm:$0xf0]  ;;  %v1958_v19 = vor.u32 %v2139_v2, %v1955_v3  ;;  %s3032_s20 = scalar_lea.vmem [#allocation11], %s1908_s29  ;;  %s2127_s21 = sshll.u32 %s2686_s28, 3 }
  0x70   : > { %640 = vmatpush.bf16.msra.mxu1 %v1982_v48  ;;  %v2859_v12 = vld [vmem:[%s2819_s14] sm:$0xff]  ;;  %v1985_v20 = vld [vmem:[#allocation7 + $0x80] sm:$0xf]  ;;  %v2147_v21 = vld [vmem:[#allocation7 + $0x88] sm:$0xf0]  ;;  %v2865_v22 = vpack.c.bf16 %v463_v8, %v462_v6  ;;  %s1738_s3 = scalar_lea.hbm %s3427_s7, %s2127_s21  ;;  %s2178_s22 = sshll.u32 %s2686_s28, 6 }
  0x71   : > { %613 = vmatpush.bf16.msra.mxu0 %v1954_v30  ;;  %v2172_v14 = vld [vmem:[#allocation8 + $0x94] sm:$0xf]  ;;  %v2093_v15 = vld [vmem:[#allocation8 + $0x98] sm:$0xf]  ;;  %668 = vmatpush.bf16.msra.mxu2 %v1998_v9  ;;  %v2087_v24 = vld [vmem:[#allocation8 + $0x9c] sm:$0xf0]  ;;  %v1986_v27 = vor.u32 %v2147_v21, %v1985_v20  ;;  %v2869_v28 = vpack.c.bf16 %v2859_v12, %v2859_v12  ;;  %s3368_s15 = scalar_lea.hbm %s3426_s6, %s2178_s22 }
  0x72   : > { %837 = vmatpush.bf16.msra.mxu3 %v2845_v34  ;;  %v2136_v25 = vld [vmem:[#allocation7 + $0x34] sm:$0xf]  ;;  %v1943_v26 = vld [vmem:[#allocation7 + $0x3c] sm:$0xf0]  ;;  %v2169_v29 = vld [vmem:[#allocation8 + $0x7c] sm:$0xf]  ;;  %v2873_v30 = vor.u32 %v2174_v18, %v2093_v15  ;;  %v2876_v32 = vor.u32 %v2172_v14, %v2087_v24 }
  0x73   : > { %v2081_v31 = vld [vmem:[#allocation8 + $0x80] sm:$0xf]  ;;  %v2171_v33 = vld [vmem:[#allocation8 + $0x88] sm:$0xf0]  ;;  %v1946_v35 = vor.u32 %v2136_v25, %v1943_v26  ;;  %v1973_v36 = vld [vmem:[#allocation7 + $0x68] sm:$0xf] }
  0x74   : > { %641 = vmatpush.bf16.msra.mxu1 %v1970_v0  ;;  %v2144_v37 = vld [vmem:[#allocation7 + $0x70] sm:$0xf0]  ;;  %v2075_v38 = vld [vmem:[#allocation8 + $0x84] sm:$0xf0]  ;;  %v2133_v39 = vld [vmem:[#allocation7 + $0x1c] sm:$0xf]  ;;  %v2881_v45 = vor.u32 %v2171_v33, %v2081_v31 }
  0x75   : > { %614 = vmatpush.bf16.msra.mxu0 %v1942_v42  ;;  %v1931_v40 = vld [vmem:[#allocation7 + $0x24] sm:$0xf0]  ;;  %669 = vmatpush.bf16.msra.mxu2 %v1986_v27  ;;  %v1974_v41 = vor.u32 %v2144_v37, %v1973_v36  ;;  %v1961_v42 = vld [vmem:[#allocation7 + $0x50] sm:$0xf]  ;;  %v2141_v44 = vld [vmem:[#allocation7 + $0x58] sm:$0xf0]  ;;  %v2884_v46 = vor.u32 %v2169_v29, %v2075_v38 }
  0x76   : > { %838 = vmatpush.bf16.msra.mxu3 %v2848_v43  ;;  %v2166_v47 = vld [vmem:[#allocation8 + $0x64] sm:$0xf]  ;;  %v2069_v48 = vld [vmem:[#allocation8 + $0x68] sm:$0xf]  ;;  %v2168_v49 = vld [vmem:[#allocation8 + $0x70] sm:$0xf0]  ;;  %v1934_v50 = vor.u32 %v2133_v39, %v1931_v40  ;;  %v1962_v54 = vor.u32 %v2141_v44, %v1961_v42 }
  0x77   : > { %v2063_v51 = vld [vmem:[#allocation8 + $0x6c] sm:$0xf0]  ;;  %v2130_v52 = vld [vmem:[#allocation7 + $0x4] sm:$0xf]  ;;  %v1949_v55 = vld [vmem:[#allocation7 + $0x38] sm:$0xf]  ;;  %v2887_v57 = vor.u32 %v2168_v49, %v2069_v48 }
  0x78   : > { %642 = vmatpush.bf16.msra.mxu1 %v1958_v19  ;;  %v2138_v56 = vld [vmem:[#allocation7 + $0x40] sm:$0xf0]  ;;  %v2890_v59 = vor.u32 %v2166_v47, %v2063_v51  ;;  %v2057_v61 = vld [vmem:[#allocation8 + $0x50] sm:$0xf]  ;;  %v2165_v62 = vld [vmem:[#allocation8 + $0x58] sm:$0xf0] }
  0x79   : > { %615 = vmatpush.bf16.msra.mxu0 %v1930_v53  ;;  %v1919_v53 = vld [vmem:[#allocation7 + $0xc] sm:$0xf0]  ;;  %670 = vmatpush.bf16.msra.mxu2 %v1974_v41  ;;  %v2163_v63 = vld [vmem:[#allocation8 + $0x4c] sm:$0xf]  ;;  %v2051_v0 = vld [vmem:[#allocation8 + $0x54] sm:$0xf0]  ;;  %v1950_v2 = vor.u32 %v2138_v56, %v1949_v55  ;;  %v2895_v6 = vor.u32 %v2165_v62, %v2057_v61 }
  0x7a   : > { %839 = vmatpush.bf16.msra.mxu3 %v2851_v58  ;;  %v1922_v60 = vor.u32 %v2130_v52, %v1919_v53  ;;  %v464_v1 = vld [vmem:[%s2809_s0 + $0x10] sm:$0xff]  ;;  %v465_v3 = vld [vmem:[%s2809_s0 + $0x18] sm:$0xff]  ;;  %v2898_v8 = vor.u32 %v2163_v63, %v2051_v0  ;;  %v2045_v9 = vld [vmem:[#allocation8 + $0x38] sm:$0xf]  ;;  %s394_s9 = scalar_lea.vmem [#allocation12], %s1909_s12  ;;  %s1742_s17 = sshll.u32 %s1738_s3, 4  ;;  %s1743_s17 = int_to_ptr.hbm [resolvable:$true] %s1742_s17 }
  0x7b   : > { %v1937_v4 = vld [vmem:[#allocation7 + $0x20] sm:$0xf]  ;;  %v2162_v14 = vld [vmem:[#allocation8 + $0x40] sm:$0xf0]  ;;  %v471_v15 = vpack.c.bf16 %v465_v3, %v464_v1  ;;  %v2160_v18 = vld [vmem:[#allocation8 + $0x34] sm:$0xf] }
  0x7c   : > { %643 = vmatpush.bf16.msra.mxu1 %v1946_v35  ;;  %v2039_v19 = vld [vmem:[#allocation8 + $0x3c] sm:$0xf0]  ;;  %v2903_v21 = vor.u32 %v2162_v14, %v2045_v9  ;;  %v2157_v25 = vld [vmem:[#allocation8 + $0x1c] sm:$0xf]  ;;  %v1925_v26 = vld [vmem:[#allocation7 + $0x8] sm:$0xf] }
  0x7d   : > { %616 = vmatpush.bf16.msra.mxu0 %v1918_v5  ;;  %671 = vmatpush.bf16.msra.mxu2 %v1962_v54  ;;  %v2135_v5 = vld [vmem:[#allocation7 + $0x28] sm:$0xf0]  ;;  %v2906_v24 = vor.u32 %v2160_v18, %v2039_v19  ;;  %v2132_v27 = vld [vmem:[#allocation7 + $0x10] sm:$0xf0]  ;;  %v2027_v29 = vld [vmem:[#allocation8 + $0x24] sm:$0xf0] }
  0x7e   : > { %840 = vmatpush.bf16.msra.mxu3 %v2856_v10  ;;  %v1938_v20 = vor.u32 %v2135_v5, %v1937_v4  ;;  %v2033_v31 = vld [vmem:[#allocation8 + $0x20] sm:$0xf]  ;;  %v2159_v33 = vld [vmem:[#allocation8 + $0x28] sm:$0xf0]  ;;  %v1926_v35 = vor.u32 %v2132_v27, %v1925_v26  ;;  %v2913_v37 = vor.u32 %v2157_v25, %v2027_v29  ;;  %v2021_v38 = vld [vmem:[#allocation8 + $0x8] sm:$0xf] }
  0x7f   : > { %v2910_v36 = vor.u32 %v2159_v33, %v2033_v31  ;;  %v2156_v39 = vld [vmem:[#allocation8 + $0x10] sm:$0xf0]  ;;  %v2154_v40 = vld [vmem:[#allocation8 + $0x4] sm:$0xf]  ;;  %v2015_v41 = vld [vmem:[#allocation8 + $0xc] sm:$0xf0] }
  0x80   : > { %617 = vmatmul.bf16.vlgmr.msra.gmra.mxu0 %v2865_v22  ;;  %644 = vmatpush.bf16.msra.mxu1 %v1934_v50  ;;  %v2918_v42 = vor.u32 %v2156_v39, %v2021_v38  ;;  %v2921_v44 = vor.u32 %v2154_v40, %v2015_v41  ;;  %v466_v47 = vld [vmem:[%s2809_s0 + $0x20] sm:$0xff]  ;;  %v467_v48 = vld [vmem:[%s2809_s0 + $0x28] sm:$0xff]  ;;  %v469_v50 = vld [vmem:[%s2809_s0 + $0x38] sm:$0xff]  ;;  %s1740_s5 = sshll.u32 %s394_s9, 4  ;;  %s1723_s28 = sshll.u32 %s3032_s20, 4  ;;  %s1741_s5 = int_to_ptr.vmem [resolvable:$true] %s1740_s5  ;;  %s1724_s28 = int_to_ptr.vmem [resolvable:$true] %s1723_s28 }
  0x81   : > { %859 = vmatpush.bf16.msrb.mxu0 %v2861_v13  ;;  %841 = vmatmul.bf16.vlgmr.msra.gmra.mxu3 %v2869_v28  ;;  %v472_v49 = vpack.c.bf16 %v467_v48, %v466_v47  ;;  %v460_v52 = vld [vmem:[%s3424_s4] sm:$0x7]  ;;  %v461_v53 = vld [vmem:[#allocation10] sm:$0x7]  ;;  %s1725_s29 = sshll.u32 %s3368_s15, 4  ;;  %s1711_s10 = scalar_lea.sflag [#allocation13], %s2803_s26  ;;  %s1726_s29 = int_to_ptr.hbm [resolvable:$true] %s1725_s29 }
  0x82   : > { %846 = vmatpush.bf16.msrb.mxu3 %v2863_v16  ;;  %672 = vmatpush.bf16.msra.mxu2 %v1950_v2  ;;  %v475_v54 = vperm.slane %v460_v52, 0  ;;  %v3008_v25 = vperm.slane %v461_v53, 1  ;;  %s2523_s14 = scalar_lea.hbm %s3427_s7, 16 }
  0x84   : > { %645 = vmatpush.bf16.msra.mxu1 %v1922_v60  ;;  %v2995_v60 = vperm.slane %v461_v53, 0 }
  0x85   : > { %860 = vmatpush.bf16.msrb.mxu0 %v2873_v30 }
  0x86   : > { %847 = vmatpush.bf16.msrb.mxu3 %v2876_v32  ;;  %673 = vmatpush.bf16.msra.mxu2 %v1938_v20 }
  0x87   : > { %646 = vmatmul.bf16.vlgmr.msra.gmra.mxu1 %v2865_v22 }
  0x88   : > { %942 = vmatpush.bf16.msrb.mxu1 %v2833_v7 }
  0x89   : > { %861 = vmatpush.bf16.msrb.mxu0 %v2881_v45 }
  0x8a   : > { %848 = vmatpush.bf16.msrb.mxu3 %v2884_v46  ;;  %674 = vmatpush.bf16.msra.mxu2 %v1926_v35 }
  0x8c   : > { %943 = vmatpush.bf16.msrb.mxu1 %v2836_v11 }
  0x8d   : > { %862 = vmatpush.bf16.msrb.mxu0 %v2887_v57  ;;  %675 = vmatmul.bf16.vlgmr.msra.gmra.mxu2 %v2865_v22  ;;  %v468_v22 = vld [vmem:[%s2809_s0 + $0x30] sm:$0xff]  ;;  %s2517_s0 = sshra.s32 %s1743_s17, 4  ;;  %s2518_s0 = int_to_ptr.hbm [resolvable:$true] %s2517_s0 }
  0x8e   : > { %849 = vmatpush.bf16.msrb.mxu3 %v2890_v59  ;;  %955 = vmatpush.bf16.msrb.mxu2 %v2863_v16  ;;  %v473_v51 = vpack.c.bf16 %v469_v50, %v468_v22  ;;  %s2519_s8 = scalar_lea.hbm %s2518_s0, 8  ;;  %p2524_p2 = scmp.lt.s32.totalorder %s2518_s0, %s3427_s7 }
  0x8f   : > { %p2520_p1 = scmp.ne.s32.totalorder %s2518_s0, %s2519_s8  ;;  %p2525_p10 = scmp.lt.s32.totalorder %s2523_s14, %s2519_s8 }
  0x90   : > { %622 = vmatmul.bf16.gmra.mxu0 %v471_v15  ;;  %944 = vmatpush.bf16.msrb.mxu1 %v2839_v17 }
  0x91   : > { %863 = vmatpush.bf16.msrb.mxu0 %v2895_v6  ;;  %p2521_p4 = pnand %p2520_p1, %p2748_p7  ;;  %p2526_p11 = por %p2525_p10, %p2524_p2 }
  0x92   : > { %850 = vmatpush.bf16.msrb.mxu3 %v2898_v8  ;;  %956 = vmatpush.bf16.msrb.mxu2 %v2876_v32 }
  0x93   : > { %p2522_p8 = pneg %p2521_p4 }
  0x94   : > { %945 = vmatpush.bf16.msrb.mxu1 %v2842_v23 }
  0x95   : > { %864 = vmatpush.bf16.msrb.mxu0 %v2903_v21  ;;  %p2527_p9 = pnand %p2526_p11, %p2522_p8 }
  0x96   : > { %851 = vmatpush.bf16.msrb.mxu3 %v2906_v24  ;;  %957 = vmatpush.bf16.msrb.mxu2 %v2884_v46 }
  0x97   : > { %651 = vmatmul.bf16.gmra.mxu1 %v471_v15 }
  0x98   : > { %946 = vmatpush.bf16.msrb.mxu1 %v2845_v34 }
  0x99   : > { %865 = vmatpush.bf16.msrb.mxu0 %v2910_v36 }
  0x9a   : > { %852 = vmatpush.bf16.msrb.mxu3 %v2913_v37  ;;  %958 = vmatpush.bf16.msrb.mxu2 %v2890_v59 }
  0x9c   : > { %947 = vmatpush.bf16.msrb.mxu1 %v2848_v43 }
  0x9d   : > { %866 = vmatpush.bf16.msrb.mxu0 %v2918_v42  ;;  %680 = vmatmul.bf16.gmra.mxu2 %v471_v15  ;;  %v3004_v15 = vperm.slane %v460_v52, 1 }
  0x9e   : > { %853 = vmatpush.bf16.msrb.mxu3 %v2921_v44  ;;  %959 = vmatpush.bf16.msrb.mxu2 %v2898_v8 }
  0xa0   : > { %627 = vmatmul.bf16.gmra.mxu0 %v472_v49  ;;  %948 = vmatpush.bf16.msrb.mxu1 %v2851_v58 }
  0xa1   : > { %1051 = vmatpush.bf16.msra.mxu0 %v2833_v7  ;;  %854 = vmatmul.bf16.vlgmr.msrb.gmra.mxu3 %v2869_v28 }
  0xa2   : > { %968 = vmatpush.bf16.msra.mxu3 %v2861_v13  ;;  %960 = vmatpush.bf16.msrb.mxu2 %v2906_v24 }
  0xa4   : > { %949 = vmatpush.bf16.msrb.mxu1 %v2856_v10 }
  0xa5   : > { %1052 = vmatpush.bf16.msra.mxu0 %v2836_v11 }
  0xa6   : > { %969 = vmatpush.bf16.msra.mxu3 %v2873_v30  ;;  %961 = vmatpush.bf16.msrb.mxu2 %v2913_v37 }
  0xa7   : > { %656 = vmatmul.bf16.gmra.mxu1 %v472_v49 }
  0xa8   : > { %1064 = vmatpush.bf16.msra.mxu1 %v2863_v16 }
  0xa9   : > { %1053 = vmatpush.bf16.msra.mxu0 %v2839_v17 }
  0xaa   : > { %970 = vmatpush.bf16.msra.mxu3 %v2881_v45  ;;  %962 = vmatpush.bf16.msrb.mxu2 %v2921_v44 }
  0xac   : > { %1065 = vmatpush.bf16.msra.mxu1 %v2876_v32 }
  0xad   : > { %1054 = vmatpush.bf16.msra.mxu0 %v2842_v23  ;;  %685 = vmatmul.bf16.gmra.mxu2 %v472_v49 }
  0xae   : > { %971 = vmatpush.bf16.msra.mxu3 %v2887_v57  ;;  %1077 = vmatpush.bf16.msra.mxu2 %v2861_v13 }
  0xb0   : > { %632 = vmatmul.bf16.gmra.mxu0 %v473_v51  ;;  %1066 = vmatpush.bf16.msra.mxu1 %v2884_v46 }
  0xb1   : > { %1055 = vmatpush.bf16.msra.mxu0 %v2845_v34 }
  0xb2   : > { %972 = vmatpush.bf16.msra.mxu3 %v2895_v6  ;;  %1078 = vmatpush.bf16.msra.mxu2 %v2873_v30 }
  0xb4   : > { %1067 = vmatpush.bf16.msra.mxu1 %v2890_v59 }
  0xb5   : > { %1056 = vmatpush.bf16.msra.mxu0 %v2848_v43 }
  0xb6   : > { %973 = vmatpush.bf16.msra.mxu3 %v2903_v21  ;;  %1079 = vmatpush.bf16.msra.mxu2 %v2881_v45 }
  0xb7   : > { %661 = vmatmul.bf16.gmra.mxu1 %v473_v51 }
  0xb8   : > { %1068 = vmatpush.bf16.msra.mxu1 %v2898_v8 }
  0xb9   : > { %1057 = vmatpush.bf16.msra.mxu0 %v2851_v58 }
  0xba   : > { %974 = vmatpush.bf16.msra.mxu3 %v2910_v36  ;;  %1080 = vmatpush.bf16.msra.mxu2 %v2887_v57 }
  0xbc   : > { %1069 = vmatpush.bf16.msra.mxu1 %v2906_v24 }
  0xbd   : > { %1058 = vmatpush.bf16.msra.mxu0 %v2856_v10  ;;  %690 = vmatmul.bf16.gmra.mxu2 %v473_v51 }
  0xbe   : > { %975 = vmatpush.bf16.msra.mxu3 %v2918_v42  ;;  %1081 = vmatpush.bf16.msra.mxu2 %v2895_v6 }
  0xc0   : > { %867 = vmatmul.bf16.vlgmr.msrb.gmra.mxu0 %v2869_v28  ;;  %1070 = vmatpush.bf16.msra.mxu1 %v2913_v37 }
  0xc1   : > { %1173 = vmatpush.bf16.msrb.mxu0 %v2863_v16 }
  0xc2   : > { %1160 = vmatpush.bf16.msrb.mxu3 %v2833_v7  ;;  %1082 = vmatpush.bf16.msra.mxu2 %v2903_v21 }
  0xc4   : > { %1071 = vmatpush.bf16.msra.mxu1 %v2921_v44 }
  0xc5   : > { %1174 = vmatpush.bf16.msrb.mxu0 %v2876_v32 }
  0xc6   : > { %1161 = vmatpush.bf16.msrb.mxu3 %v2836_v11  ;;  %1083 = vmatpush.bf16.msra.mxu2 %v2910_v36 }
  0xc9   : > { %1175 = vmatpush.bf16.msrb.mxu0 %v2884_v46 }
  0xca   : > { %1162 = vmatpush.bf16.msrb.mxu3 %v2839_v17  ;;  %1084 = vmatpush.bf16.msra.mxu2 %v2918_v42 }
  0xcd   : > { %1176 = vmatpush.bf16.msrb.mxu0 %v2890_v59 }
  0xce   : > { %1163 = vmatpush.bf16.msrb.mxu3 %v2842_v23 }
  0xd1   : > { %1177 = vmatpush.bf16.msrb.mxu0 %v2898_v8 }
  0xd2   : > { %1164 = vmatpush.bf16.msrb.mxu3 %v2845_v34 }
  0xd5   : > { %1178 = vmatpush.bf16.msrb.mxu0 %v2906_v24 }
  0xd6   : > { %1165 = vmatpush.bf16.msrb.mxu3 %v2848_v43 }
  0xd9   : > { %1179 = vmatpush.bf16.msrb.mxu0 %v2913_v37 }
  0xda   : > { %1166 = vmatpush.bf16.msrb.mxu3 %v2851_v58 }
  0xdd   : > { %1180 = vmatpush.bf16.msrb.mxu0 %v2921_v44 }
  0xde   : > { %1167 = vmatpush.bf16.msrb.mxu3 %v2856_v10 }
  0xfd   : > { %v618_v28 = vpop.f32.mrf.mxu0 }
  0xfe   : > { %v619_v63 = vadd.f32 %v618_v28, %v475_v54 }
 0x104   : > { %v842_v55 = vpop.f32.mrf.mxu3  ;;  %v647_v19 = vpop.f32.mrf.mxu1 }
 0x105   : > { %v620_v56 = vpop.f32.mrf.mxu0  ;;  %v843_v62 = vadd.f32 %v842_v55, %v2995_v60  ;;  %v648_v27 = vadd.f32 %v647_v19, %v3004_v15 }
 0x106   : > { %v2997_v61 = vadd.f32 %v620_v56, %v475_v54 }
 0x107   : > { %v872_v2 = vadd.f32 %v843_v62, %v619_v63 }
 0x109   : > { %v2107_v4 = vmul.f32 -1.442695, %v872_v2  ;;  %v3018_v2 = vperm.slane %v460_v52, 2 }
 0x10b   : > { %2273 = vpow2.f32 %v2107_v4  ;;  %v3020_v4 = vperm.slane %v461_v53, 2 }
 0x10c   : > { %v844_v0 = vpop.f32.mrf.mxu3 }
 0x10d   : > { %v623_v1 = vpop.f32.mrf.mxu0 }
 0x10e   : > { %v3000_v3 = vadd.f32 %v623_v1, %v475_v54 }
 0x110   : > { %v676_v19 = vpop.f32.mrf.mxu2 }
 0x111   : > { %v2274_v14 = vpop.eup %2273 }
 0x112   : > { %v876_v26 = vadd.f32 1.0, %v2274_v14 }
 0x114   : > { %2275 = vrcp.f32 %v876_v26  ;;  %v888_v1 = vand.u32 2147483648, %v876_v26  ;;  %vm882_vm1 = vweird.f32 %v876_v26 }
 0x115   : > { %v625_v5 = vpop.f32.mrf.mxu0 }
 0x116   : > { %v3002_v9 = vadd.f32 %v625_v5, %v475_v54  ;;  %v886_v5 = vand.u32 2147483647, %v876_v26 }
 0x118   : > { %vm887_vm3 = vcmp.eq.f32.partialorder %v886_v5, 8.507059e+37 }
 0x11a   : > { %v2276_v40 = vpop.eup %2275 }
 0x11b   : > { %v878_v47 = vmul.f32 %v2276_v40, %v876_v26  ;;  %vm883_vm0 = vweird.f32 %v2276_v40 }
 0x11c   : > { %vm884_vm2 = vmor %vm882_vm1, %vm883_vm0 }
 0x11d   : > { %v628_v18 = vpop.f32.mrf.mxu0  ;;  %v879_v51 = vsub.f32 1.0, %v878_v47 }
 0x11e   : > { %v3006_v20 = vadd.f32 %v628_v18, %v475_v54 }
 0x11f   : > { %v880_v28 = vmul.f32 %v2276_v40, %v879_v51 }
 0x121   : > { %v881_v63 = vadd.f32 %v2276_v40, %v880_v28 }
 0x123   : > { %v885_v14 = vsel %vm884_vm2, %v2276_v40, %v881_v63 }
 0x124   : > { %v855_v29 = vpop.f32.mrf.mxu3 }
 0x125   : > { %v856_v31 = vadd.f32 %v855_v29, %v3008_v25  ;;  %v630_v35 = vpop.f32.mrf.mxu0  ;;  %v889_v29 = vor.u32 1.1754944e-38, %v888_v1 }
 0x126   : > { %v3012_v39 = vadd.f32 %v630_v35, %v475_v54 }
 0x127   : > { %v892_v33 = vadd.f32 %v856_v31, %v648_v27 }
 0x129   : > { %v2108_v38 = vmul.f32 -1.442695, %v892_v33  ;;  %v890_v33 = vsel %vm887_vm3, %v889_v29, %v885_v14 }
 0x12b   : > { %2277 = vpow2.f32 %v2108_v38 }
 0x12c   : > { %v857_v41 = vpop.f32.mrf.mxu3 }
 0x12d   : > { %v633_v48 = vpop.f32.mrf.mxu0 }
 0x12e   : > { %v3014_v22 = vadd.f32 %v633_v48, %v475_v54 }
 0x130   : > { %3452 = vst [vmem:[#allocation24_spill] sm:$0xff] %v3014_v22 }
 0x131   : > { %v2278_v49 = vpop.eup %2277 }
 0x132   : > { %v896_v50 = vadd.f32 1.0, %v2278_v49 }
 0x134   : > { %2279 = vrcp.f32 %v896_v50  ;;  %vm902_vm4 = vweird.f32 %v896_v50  ;;  %v908_v53 = vand.u32 2147483648, %v896_v50  ;;  %v906_v40 = vand.u32 2147483647, %v896_v50 }
 0x135   : > { %v635_v55 = vpop.f32.mrf.mxu0 }
 0x136   : > { %v3016_v56 = vadd.f32 %v635_v55, %v475_v54  ;;  %v677_v54 = vadd.f32 %v676_v19, %v3018_v2  ;;  %v909_v47 = vor.u32 1.1754944e-38, %v908_v53  ;;  %vm907_vm7 = vcmp.eq.f32.partialorder %v906_v40, 8.507059e+37  ;;  %v649_v19 = vpop.f32.mrf.mxu1 }
 0x138   : > { %3453 = vst [vmem:[#allocation25_spill] sm:$0xff] %v3016_v56 }
 0x13a   : > { %v2280_v62 = vpop.eup %2279 }
 0x13b   : > { %v898_v0 = vmul.f32 %v2280_v62, %v896_v50  ;;  %vm903_vm5 = vweird.f32 %v2280_v62 }
 0x13c   : > { %vm904_vm6 = vmor %vm902_vm4, %vm903_vm5 }
 0x13d   : > { %v899_v18 = vsub.f32 1.0, %v898_v0  ;;  %v868_v27 = vpop.f32.mrf.mxu0 }
 0x13e   : > { %v869_v31 = vadd.f32 %v868_v27, %v3020_v4  ;;  %v678_v27 = vpop.f32.mrf.mxu2  ;;  %v3073_v29 = vpop.f32.mrf.mxu1 }
 0x13f   : > { %v900_v38 = vmul.f32 %v2280_v62, %v899_v18 }
 0x140   : > { %v912_v35 = vmul.f32 %v890_v33, %v869_v31 }
 0x141   : > { %v901_v26 = vadd.f32 %v2280_v62, %v900_v38 }
 0x142   : > { %v913_v52 = vadd.f32 %v912_v35, %v677_v54 }
 0x143   : > { %v905_v48 = vsel %vm904_vm6, %v2280_v62, %v901_v26 }
 0x144   : > { %2281 = vtanh.f32 %v913_v52  ;;  %v910_v28 = vsel %vm907_vm7, %v909_v47, %v905_v48 }
 0x145   : > { %v870_v41 = vpop.f32.mrf.mxu0 }
 0x146   : > { %v3075_v54 = vpop.f32.mrf.mxu2  ;;  %v3077_v31 = vpop.f32.mrf.mxu1 }
 0x14a   : > { %v2282_v49 = vpop.eup %2281 }
 0x14b   : > { %v915_v51 = vsub.f32 %v2859_v12, %v2282_v49 }
 0x14d   : > { %v916_v55 = vmul.f32 %v915_v51, %v910_v28 }
 0x14e   : > { %v3079_v33 = vpop.f32.mrf.mxu2  ;;  %v3081_v35 = vpop.f32.mrf.mxu1 }
 0x14f   : > { %v3025_v63 = vadd.f32 %v2282_v49, %v916_v55 }
 0x151   : > { %v919_v0 = vrot.slane %v3025_v63, 1  ;;  %v920_v1 = vrot.slane %v3025_v63, 2  ;;  %v921_v5 = vrot.slane %v3025_v63, 3  ;;  %933 = vst [vmem:[%s3032_s20] sm:$0x1] %v3025_v63  ;;  %v922_v12 = vrot.slane %v3025_v63, 4 }
 0x152   : > { %v941_v50 = vpack.c.bf16 %v3025_v63, %v3025_v63  ;;  %v923_v62 = vrot.slane %v3025_v63, 5  ;;  %v924_v14 = vrot.slane %v3025_v63, 6  ;;  %v925_v18 = vrot.slane %v3025_v63, 7 }
 0x153   : > { %934 = vst [vmem:[%s3032_s20 + $0x8] sm:$0x1] %v919_v0  ;;  %v650_v0 = vadd.f32 %v649_v19, %v3004_v15 }
 0x154   : > { %935 = vst [vmem:[%s3032_s20 + $0x10] sm:$0x1] %v920_v1  ;;  %950 = vmatmul.bf16.vlgmr.msrb.gmra.mxu1 %v941_v50  ;;  %963 = vmatmul.bf16.vlgmr.msrb.gmra.mxu2 %v941_v50 }
 0x155   : > { %936 = vst [vmem:[%s3032_s20 + $0x18] sm:$0x1] %v921_v5  ;;  %976 = vmatmul.bf16.vlgmr.msra.gmra.mxu3 %v941_v50  ;;  %1186 = vmatpush.bf16.msrb.mxu1 %v2861_v13 }
 0x156   : > { %937 = vst [vmem:[%s3032_s20 + $0x20] sm:$0x1] %v922_v12  ;;  %1269 = vmatpush.bf16.msrb.mxu2 %v2833_v7  ;;  %1282 = vmatpush.bf16.msra.mxu3 %v2863_v16  ;;  %v3083_v38 = vpop.f32.mrf.mxu2  ;;  %v3085_v52 = vpop.f32.mrf.mxu1 }
 0x157   : > { %938 = vst [vmem:[%s3032_s20 + $0x28] sm:$0x1] %v923_v62 }
 0x158   : > { %939 = vst [vmem:[%s3032_s20 + $0x30] sm:$0x1] %v924_v14 }
 0x159   : > { %940 = vst [vmem:[%s3032_s20 + $0x38] sm:$0x1] %v925_v18  ;;  %1187 = vmatpush.bf16.msrb.mxu1 %v2873_v30 }
 0x15a   : > { %1270 = vmatpush.bf16.msrb.mxu2 %v2836_v11  ;;  %1283 = vmatpush.bf16.msra.mxu3 %v2876_v32 }
 0x15d   : > { %1188 = vmatpush.bf16.msrb.mxu1 %v2881_v45 }
 0x15e   : > { %1271 = vmatpush.bf16.msrb.mxu2 %v2839_v17  ;;  %1284 = vmatpush.bf16.msra.mxu3 %v2884_v46  ;;  %v3087_v53 = vpop.f32.mrf.mxu2  ;;  %v3089_v26 = vpop.f32.mrf.mxu1 }
 0x15f   : > { %3454 = vst [vmem:[#allocation26_spill] sm:$0xff] %v3089_v26 }
 0x161   : > { %1189 = vmatpush.bf16.msrb.mxu1 %v2887_v57 }
 0x162   : > { %1272 = vmatpush.bf16.msrb.mxu2 %v2842_v23  ;;  %1285 = vmatpush.bf16.msra.mxu3 %v2890_v59 }
 0x165   : > { %1190 = vmatpush.bf16.msrb.mxu1 %v2895_v6 }
 0x166   : > { %1273 = vmatpush.bf16.msrb.mxu2 %v2845_v34  ;;  %1286 = vmatpush.bf16.msra.mxu3 %v2898_v8  ;;  %v3091_v40 = vpop.f32.mrf.mxu2  ;;  %v3093_v41 = vpop.f32.mrf.mxu1 }
 0x167   : > { %3455 = vst [vmem:[#allocation27_spill] sm:$0xff] %v3091_v40 }
 0x168   : > { %3456 = vst [vmem:[#allocation28_spill] sm:$0xff] %v3093_v41 }
 0x169   : > { %1191 = vmatpush.bf16.msrb.mxu1 %v2903_v21 }
 0x16a   : > { %1274 = vmatpush.bf16.msrb.mxu2 %v2848_v43  ;;  %1287 = vmatpush.bf16.msra.mxu3 %v2906_v24 }
 0x16d   : > { %1192 = vmatpush.bf16.msrb.mxu1 %v2910_v36 }
 0x16e   : > { %1275 = vmatpush.bf16.msrb.mxu2 %v2851_v58  ;;  %1288 = vmatpush.bf16.msra.mxu3 %v2913_v37  ;;  %v3095_v47 = vpop.f32.mrf.mxu2 }
 0x16f   : > { %3457 = vst [vmem:[#allocation29_spill] sm:$0xff] %v3095_v47 }
 0x171   : > { %1193 = vmatpush.bf16.msrb.mxu1 %v2918_v42 }
 0x172   : > { %1276 = vmatpush.bf16.msrb.mxu2 %v2856_v10  ;;  %1289 = vmatpush.bf16.msra.mxu3 %v2921_v44 }
 0x1d1   : > { %v951_v48 = vpop.f32.mrf.mxu1 }
 0x1d2   : > { %v952_v49 = vadd.f32 %v951_v48, %v2995_v60 }
 0x1d4   : > { %v981_v51 = vadd.f32 %v952_v49, %v2997_v61 }
 0x1d6   : > { %v2109_v28 = vmul.f32 -1.442695, %v981_v51 }
 0x1d7   : > { %v964_v55 = vpop.f32.mrf.mxu2 }
 0x1d8   : > { %2283 = vpow2.f32 %v2109_v28  ;;  %v965_v1 = vadd.f32 %v964_v55, %v3008_v25  ;;  %v977_v5 = vpop.f32.mrf.mxu3 }
 0x1d9   : > { %v953_v12 = vpop.f32.mrf.mxu1 }
 0x1da   : > { %v1001_v50 = vadd.f32 %v965_v1, %v650_v0 }
 0x1dc   : > { %v2110_v62 = vmul.f32 -1.442695, %v1001_v50 }
 0x1de   : > { %v2284_v14 = vpop.eup %2283  ;;  %2285 = vpow2.f32 %v2110_v62 }
 0x1df   : > { %v985_v18 = vadd.f32 1.0, %v2284_v14  ;;  %v966_v47 = vpop.f32.mrf.mxu2  ;;  %v679_v14 = vadd.f32 %v678_v27, %v3018_v2 }
 0x1e0   : > { %v979_v56 = vpop.f32.mrf.mxu3 }
 0x1e1   : > { %2287 = vrcp.f32 %v985_v18  ;;  %v997_v19 = vand.u32 2147483648, %v985_v18  ;;  %v995_v55 = vand.u32 2147483647, %v985_v18  ;;  %vm991_vm9 = vweird.f32 %v985_v18 }
 0x1e2   : > { %v978_v56 = vadd.f32 %v977_v5, %v3020_v4 }
 0x1e3   : > { %v998_v1 = vor.u32 1.1754944e-38, %v997_v19  ;;  %vm996_vm11 = vcmp.eq.f32.partialorder %v995_v55, 8.507059e+37 }
 0x1e4   : > { %v2286_v48 = vpop.eup %2285 }
 0x1e5   : > { %v1005_v41 = vadd.f32 1.0, %v2286_v48 }
 0x1e7   : > { %v2288_v61 = vpop.eup %2287  ;;  %2289 = vrcp.f32 %v1005_v41  ;;  %v1017_v26 = vand.u32 2147483648, %v1005_v41  ;;  %vm1011_vm13 = vweird.f32 %v1005_v41 }
 0x1e8   : > { %v987_v49 = vmul.f32 %v2288_v61, %v985_v18  ;;  %vm992_vm8 = vweird.f32 %v2288_v61  ;;  %v1015_v18 = vand.u32 2147483647, %v1005_v41 }
 0x1e9   : > { %vm993_vm10 = vmor %vm991_vm9, %vm992_vm8  ;;  %v1018_v5 = vor.u32 1.1754944e-38, %v1017_v26 }
 0x1ea   : > { %v988_v51 = vsub.f32 1.0, %v987_v49  ;;  %vm1016_vm15 = vcmp.eq.f32.partialorder %v1015_v18, 8.507059e+37 }
 0x1ec   : > { %v989_v28 = vmul.f32 %v2288_v61, %v988_v51 }
 0x1ed   : > { %v2290_v40 = vpop.eup %2289 }
 0x1ee   : > { %v1007_v12 = vmul.f32 %v2290_v40, %v1005_v41  ;;  %v990_v0 = vadd.f32 %v2288_v61, %v989_v28  ;;  %vm1012_vm12 = vweird.f32 %v2290_v40 }
 0x1ef   : > { %vm1013_vm14 = vmor %vm1011_vm13, %vm1012_vm12 }
 0x1f0   : > { %v1008_v50 = vsub.f32 1.0, %v1007_v12  ;;  %v994_v47 = vsel %vm993_vm10, %v2288_v61, %v990_v0 }
 0x1f1   : > { %v999_v62 = vsel %vm996_vm11, %v998_v1, %v994_v47 }
 0x1f2   : > { %v1021_v48 = vmul.f32 %v999_v62, %v978_v56  ;;  %v1009_v49 = vmul.f32 %v2290_v40, %v1008_v50  ;;  %v653_v62 = vadd.f32 %v3073_v29, %v3004_v15 }
 0x1f4   : > { %v1022_v22 = vadd.f32 %v1021_v48, %v679_v14  ;;  %v1010_v51 = vadd.f32 %v2290_v40, %v1009_v49 }
 0x1f6   : > { %2291 = vtanh.f32 %v1022_v22  ;;  %v1014_v19 = vsel %vm1013_vm14, %v2290_v40, %v1010_v51 }
 0x1f7   : > { %v1019_v27 = vsel %vm1016_vm15, %v1018_v5, %v1014_v19 }
 0x1fc   : > { %v2292_v28 = vpop.eup %2291 }
 0x1fd   : > { %v1024_v61 = vsub.f32 %v3025_v63, %v2292_v28 }
 0x1ff   : > { %v1025_v55 = vmul.f32 %v1024_v61, %v1019_v27 }
 0x201   : > { %v3104_v12 = vadd.f32 %v2292_v28, %v1025_v55 }
 0x203   : > { %v1028_v22 = vrot.slane %v3104_v12, 1  ;;  %v1029_v0 = vrot.slane %v3104_v12, 2  ;;  %v1030_v41 = vrot.slane %v3104_v12, 3  ;;  %1042 = vst [vmem:[%s3032_s20 + $0x1] sm:$0x1] %v3104_v12  ;;  %v1031_v26 = vrot.slane %v3104_v12, 4 }
 0x204   : > { %v1050_v63 = vpack.c.bf16 %v3104_v12, %v3104_v12  ;;  %v1032_v40 = vrot.slane %v3104_v12, 5  ;;  %v1033_v1 = vrot.slane %v3104_v12, 6  ;;  %v1034_v50 = vrot.slane %v3104_v12, 7 }
 0x205   : > { %1043 = vst [vmem:[%s3032_s20 + $0x9] sm:$0x1] %v1028_v22 }
 0x206   : > { %1044 = vst [vmem:[%s3032_s20 + $0x11] sm:$0x1] %v1029_v0  ;;  %1059 = vmatmul.bf16.vlgmr.msra.gmra.mxu0 %v1050_v63  ;;  %1072 = vmatmul.bf16.vlgmr.msra.gmra.mxu1 %v1050_v63 }
 0x207   : > { %1045 = vst [vmem:[%s3032_s20 + $0x19] sm:$0x1] %v1030_v41  ;;  %1085 = vmatmul.bf16.vlgmr.msra.gmra.mxu2 %v1050_v63  ;;  %1295 = vmatpush.bf16.msra.mxu0 %v2861_v13 }
 0x208   : > { %1046 = vst [vmem:[%s3032_s20 + $0x21] sm:$0x1] %v1031_v26  ;;  %1378 = vmatpush.bf16.msra.mxu1 %v2833_v7  ;;  %1391 = vmatpush.bf16.msra.mxu2 %v2863_v16 }
 0x209   : > { %1047 = vst [vmem:[%s3032_s20 + $0x29] sm:$0x1] %v1032_v40 }
 0x20a   : > { %1048 = vst [vmem:[%s3032_s20 + $0x31] sm:$0x1] %v1033_v1 }
 0x20b   : > { %1049 = vst [vmem:[%s3032_s20 + $0x39] sm:$0x1] %v1034_v50  ;;  %1296 = vmatpush.bf16.msra.mxu0 %v2873_v30 }
 0x20c   : > { %1379 = vmatpush.bf16.msra.mxu1 %v2836_v11  ;;  %1392 = vmatpush.bf16.msra.mxu2 %v2876_v32 }
 0x20f   : > { %1297 = vmatpush.bf16.msra.mxu0 %v2881_v45 }
 0x210   : > { %1380 = vmatpush.bf16.msra.mxu1 %v2839_v17  ;;  %1393 = vmatpush.bf16.msra.mxu2 %v2884_v46 }
 0x213   : > { %1298 = vmatpush.bf16.msra.mxu0 %v2887_v57 }
 0x214   : > { %1381 = vmatpush.bf16.msra.mxu1 %v2842_v23  ;;  %1394 = vmatpush.bf16.msra.mxu2 %v2890_v59 }
 0x217   : > { %1299 = vmatpush.bf16.msra.mxu0 %v2895_v6 }
 0x218   : > { %1382 = vmatpush.bf16.msra.mxu1 %v2845_v34  ;;  %1395 = vmatpush.bf16.msra.mxu2 %v2898_v8 }
 0x21b   : > { %1300 = vmatpush.bf16.msra.mxu0 %v2903_v21 }
 0x21c   : > { %1383 = vmatpush.bf16.msra.mxu1 %v2848_v43  ;;  %1396 = vmatpush.bf16.msra.mxu2 %v2906_v24 }
 0x21f   : > { %1301 = vmatpush.bf16.msra.mxu0 %v2910_v36 }
 0x220   : > { %1384 = vmatpush.bf16.msra.mxu1 %v2851_v58  ;;  %1397 = vmatpush.bf16.msra.mxu2 %v2913_v37 }
 0x223   : > { %1302 = vmatpush.bf16.msra.mxu0 %v2918_v42 }
 0x224   : > { %1385 = vmatpush.bf16.msra.mxu1 %v2856_v10  ;;  %1398 = vmatpush.bf16.msra.mxu2 %v2921_v44 }
 0x283   : > { %v1060_v56 = vpop.f32.mrf.mxu0  ;;  %v1073_v47 = vpop.f32.mrf.mxu1 }
 0x284   : > { %v1061_v14 = vadd.f32 %v1060_v56, %v2995_v60  ;;  %v1074_v48 = vadd.f32 %v1073_v47, %v3008_v25 }
 0x286   : > { %v1090_v49 = vadd.f32 %v1061_v14, %v3000_v3  ;;  %v1110_v51 = vadd.f32 %v1074_v48, %v653_v62 }
 0x288   : > { %v2111_v18 = vmul.f32 -1.442695, %v1090_v49  ;;  %v2112_v19 = vmul.f32 -1.442695, %v1110_v51 }
 0x28a   : > { %2293 = vpow2.f32 %v2111_v18  ;;  %v1086_v28 = vpop.f32.mrf.mxu2  ;;  %v682_v18 = vadd.f32 %v3075_v54, %v3018_v2 }
 0x28b   : > { %2295 = vpow2.f32 %v2112_v19  ;;  %v1062_v5 = vpop.f32.mrf.mxu0  ;;  %v1075_v61 = vpop.f32.mrf.mxu1  ;;  %v1087_v48 = vadd.f32 %v1086_v28, %v3020_v4 }
 0x290   : > { %v2294_v27 = vpop.eup %2293 }
 0x291   : > { %v2296_v55 = vpop.eup %2295  ;;  %v1094_v22 = vadd.f32 1.0, %v2294_v27 }
 0x292   : > { %v1114_v0 = vadd.f32 1.0, %v2296_v55  ;;  %v1088_v41 = vpop.f32.mrf.mxu2 }
 0x293   : > { %2297 = vrcp.f32 %v1094_v22  ;;  %v1106_v1 = vand.u32 2147483648, %v1094_v22  ;;  %v1104_v56 = vand.u32 2147483647, %v1094_v22  ;;  %vm1100_vm1 = vweird.f32 %v1094_v22 }
 0x294   : > { %2299 = vrcp.f32 %v1114_v0  ;;  %v1126_v55 = vand.u32 2147483648, %v1114_v0  ;;  %vm1120_vm5 = vweird.f32 %v1114_v0 }
 0x295   : > { %v1107_v14 = vor.u32 1.1754944e-38, %v1106_v1  ;;  %vm1105_vm3 = vcmp.eq.f32.partialorder %v1104_v56, 8.507059e+37 }
 0x299   : > { %v2298_v29 = vpop.eup %2297 }
 0x29a   : > { %v2300_v26 = vpop.eup %2299  ;;  %v1096_v63 = vmul.f32 %v2298_v29, %v1094_v22  ;;  %vm1101_vm0 = vweird.f32 %v2298_v29  ;;  %v1124_v22 = vand.u32 2147483647, %v1114_v0 }
 0x29b   : > { %v1116_v3 = vmul.f32 %v2300_v26, %v1114_v0  ;;  %vm1102_vm2 = vmor %vm1100_vm1, %vm1101_vm0  ;;  %vm1121_vm4 = vweird.f32 %v2300_v26 }
 0x29c   : > { %v1097_v40 = vsub.f32 1.0, %v1096_v63  ;;  %vm1122_vm6 = vmor %vm1120_vm5, %vm1121_vm4  ;;  %vm1125_vm7 = vcmp.eq.f32.partialorder %v1124_v22, 8.507059e+37 }
 0x29d   : > { %v1117_v62 = vsub.f32 1.0, %v1116_v3 }
 0x29e   : > { %v1098_v50 = vmul.f32 %v2298_v29, %v1097_v40 }
 0x29f   : > { %v1118_v5 = vmul.f32 %v2300_v26, %v1117_v62 }
 0x2a0   : > { %v1099_v47 = vadd.f32 %v2298_v29, %v1098_v50 }
 0x2a1   : > { %v1119_v27 = vadd.f32 %v2300_v26, %v1118_v5 }
 0x2a2   : > { %v1103_v49 = vsel %vm1102_vm2, %v2298_v29, %v1099_v47  ;;  %v1127_v29 = vor.u32 1.1754944e-38, %v1126_v55 }
 0x2a3   : > { %v1108_v51 = vsel %vm1105_vm3, %v1107_v14, %v1103_v49  ;;  %v1123_v41 = vsel %vm1122_vm6, %v2300_v26, %v1119_v27 }
 0x2a4   : > { %v1130_v19 = vmul.f32 %v1108_v51, %v1087_v48  ;;  %v1128_v54 = vsel %vm1125_vm7, %v1127_v29, %v1123_v41  ;;  %v655_v48 = vadd.f32 %v3077_v31, %v3004_v15 }
 0x2a6   : > { %v1131_v61 = vadd.f32 %v1130_v19, %v682_v18 }
 0x2a8   : > { %2301 = vtanh.f32 %v1131_v61 }
 0x2ae   : > { %v2302_v28 = vpop.eup %2301 }
 0x2af   : > { %v1133_v63 = vsub.f32 %v3104_v12, %v2302_v28 }
 0x2b1   : > { %v1134_v40 = vmul.f32 %v1133_v63, %v1128_v54 }
 0x2b3   : > { %v3157_v3 = vadd.f32 %v2302_v28, %v1134_v40 }
 0x2b5   : > { %v1137_v1 = vrot.slane %v3157_v3, 1  ;;  %v1138_v50 = vrot.slane %v3157_v3, 2  ;;  %v1139_v0 = vrot.slane %v3157_v3, 3  ;;  %1151 = vst [vmem:[%s3032_s20 + $0x2] sm:$0x1] %v3157_v3  ;;  %v1140_v26 = vrot.slane %v3157_v3, 4 }
 0x2b6   : > { %v1159_v12 = vpack.c.bf16 %v3157_v3, %v3157_v3  ;;  %v1141_v56 = vrot.slane %v3157_v3, 5  ;;  %v1142_v47 = vrot.slane %v3157_v3, 6  ;;  %v1143_v62 = vrot.slane %v3157_v3, 7 }
 0x2b7   : > { %1152 = vst [vmem:[%s3032_s20 + $0xa] sm:$0x1] %v1137_v1 }
 0x2b8   : > { %1153 = vst [vmem:[%s3032_s20 + $0x12] sm:$0x1] %v1138_v50  ;;  %1168 = vmatmul.bf16.vlgmr.msrb.gmra.mxu3 %v1159_v12  ;;  %1181 = vmatmul.bf16.vlgmr.msrb.gmra.mxu0 %v1159_v12 }
 0x2b9   : > { %1154 = vst [vmem:[%s3032_s20 + $0x1a] sm:$0x1] %v1139_v0  ;;  %1194 = vmatmul.bf16.vlgmr.msrb.gmra.mxu1 %v1159_v12  ;;  %1404 = vmatpush.bf16.msrb.mxu3 %v2861_v13 }
 0x2ba   : > { %1155 = vst [vmem:[%s3032_s20 + $0x22] sm:$0x1] %v1140_v26  ;;  %1487 = vmatpush.bf16.msrb.mxu0 %v2833_v7  ;;  %1500 = vmatpush.bf16.msrb.mxu1 %v2863_v16 }
 0x2bb   : > { %1156 = vst [vmem:[%s3032_s20 + $0x2a] sm:$0x1] %v1141_v56 }
 0x2bc   : > { %1157 = vst [vmem:[%s3032_s20 + $0x32] sm:$0x1] %v1142_v47 }
 0x2bd   : > { %1158 = vst [vmem:[%s3032_s20 + $0x3a] sm:$0x1] %v1143_v62  ;;  %1405 = vmatpush.bf16.msrb.mxu3 %v2873_v30 }
 0x2be   : > { %1488 = vmatpush.bf16.msrb.mxu0 %v2836_v11  ;;  %1501 = vmatpush.bf16.msrb.mxu1 %v2876_v32 }
 0x2c1   : > { %1406 = vmatpush.bf16.msrb.mxu3 %v2881_v45 }
 0x2c2   : > { %1489 = vmatpush.bf16.msrb.mxu0 %v2839_v17  ;;  %1502 = vmatpush.bf16.msrb.mxu1 %v2884_v46 }
 0x2c5   : > { %1407 = vmatpush.bf16.msrb.mxu3 %v2887_v57 }
 0x2c6   : > { %1490 = vmatpush.bf16.msrb.mxu0 %v2842_v23  ;;  %1503 = vmatpush.bf16.msrb.mxu1 %v2890_v59 }
 0x2c9   : > { %1408 = vmatpush.bf16.msrb.mxu3 %v2895_v6 }
 0x2ca   : > { %1491 = vmatpush.bf16.msrb.mxu0 %v2845_v34  ;;  %1504 = vmatpush.bf16.msrb.mxu1 %v2898_v8 }
 0x2cd   : > { %1409 = vmatpush.bf16.msrb.mxu3 %v2903_v21 }
 0x2ce   : > { %1492 = vmatpush.bf16.msrb.mxu0 %v2848_v43  ;;  %1505 = vmatpush.bf16.msrb.mxu1 %v2906_v24 }
 0x2d1   : > { %1410 = vmatpush.bf16.msrb.mxu3 %v2910_v36 }
 0x2d2   : > { %1493 = vmatpush.bf16.msrb.mxu0 %v2851_v58  ;;  %1506 = vmatpush.bf16.msrb.mxu1 %v2913_v37 }
 0x2d5   : > { %1411 = vmatpush.bf16.msrb.mxu3 %v2918_v42 }
 0x2d6   : > { %1494 = vmatpush.bf16.msrb.mxu0 %v2856_v10  ;;  %1507 = vmatpush.bf16.msrb.mxu1 %v2921_v44 }
 0x335   : > { %v1182_v14 = vpop.f32.mrf.mxu0 }
 0x336   : > { %v1183_v49 = vadd.f32 %v1182_v14, %v3008_v25  ;;  %v1195_v51 = vpop.f32.mrf.mxu1 }
 0x338   : > { %v1219_v18 = vadd.f32 %v1183_v49, %v655_v48  ;;  %v1196_v48 = vadd.f32 %v1195_v51, %v3020_v4 }
 0x33a   : > { %v2114_v19 = vmul.f32 -1.442695, %v1219_v18 }
 0x33b   : > { %v1169_v5 = vpop.f32.mrf.mxu3 }
 0x33c   : > { %v1170_v61 = vadd.f32 %v1169_v5, %v2995_v60  ;;  %2303 = vpow2.f32 %v2114_v19  ;;  %v684_v19 = vadd.f32 %v3079_v33, %v3018_v2 }
 0x33d   : > { %v1184_v27 = vpop.f32.mrf.mxu0 }
 0x33e   : > { %v1199_v55 = vadd.f32 %v1170_v61, %v3002_v9  ;;  %v1197_v22 = vpop.f32.mrf.mxu1 }
 0x340   : > { %v2113_v41 = vmul.f32 -1.442695, %v1199_v55 }
 0x342   : > { %2305 = vpow2.f32 %v2113_v41  ;;  %v2304_v29 = vpop.eup %2303 }
 0x343   : > { %v1171_v28 = vpop.f32.mrf.mxu3  ;;  %v1223_v54 = vadd.f32 1.0, %v2304_v29 }
 0x345   : > { %v1235_v22 = vand.u32 2147483648, %v1223_v54  ;;  %vm1229_vm13 = vweird.f32 %v1223_v54  ;;  %v1233_v41 = vand.u32 2147483647, %v1223_v54 }
 0x347   : > { %v1236_v29 = vor.u32 1.1754944e-38, %v1235_v22  ;;  %vm1234_vm15 = vcmp.eq.f32.partialorder %v1233_v41, 8.507059e+37  ;;  %v687_v41 = vadd.f32 %v3083_v38, %v3018_v2 }
 0x348   : > { %v2306_v63 = vpop.eup %2305 }
 0x349   : > { %v1203_v31 = vadd.f32 1.0, %v2306_v63 }
 0x34b   : > { %2307 = vrcp.f32 %v1203_v31  ;;  %v1215_v12 = vand.u32 2147483648, %v1203_v31  ;;  %v1213_v9 = vand.u32 2147483647, %v1203_v31  ;;  %vm1209_vm9 = vweird.f32 %v1203_v31 }
 0x34c   : > { %2309 = vrcp.f32 %v1223_v54 }
 0x34d   : > { %v1216_v14 = vor.u32 1.1754944e-38, %v1215_v12  ;;  %vm1214_vm11 = vcmp.eq.f32.partialorder %v1213_v9, 8.507059e+37 }
 0x351   : > { %v2308_v40 = vpop.eup %2307 }
 0x352   : > { %v2310_v1 = vpop.eup %2309  ;;  %v1205_v50 = vmul.f32 %v2308_v40, %v1203_v31  ;;  %vm1210_vm8 = vweird.f32 %v2308_v40 }
 0x353   : > { %v1225_v26 = vmul.f32 %v2310_v1, %v1223_v54  ;;  %vm1211_vm10 = vmor %vm1209_vm9, %vm1210_vm8  ;;  %vm1230_vm12 = vweird.f32 %v2310_v1 }
 0x354   : > { %v1206_v0 = vsub.f32 1.0, %v1205_v50  ;;  %vm1231_vm14 = vmor %vm1229_vm13, %vm1230_vm12 }
 0x355   : > { %v1226_v62 = vsub.f32 1.0, %v1225_v26 }
 0x356   : > { %v1207_v56 = vmul.f32 %v2308_v40, %v1206_v0 }
 0x357   : > { %v1227_v61 = vmul.f32 %v2310_v1, %v1226_v62 }
 0x358   : > { %v1208_v47 = vadd.f32 %v2308_v40, %v1207_v56 }
 0x359   : > { %v1228_v55 = vadd.f32 %v2310_v1, %v1227_v61 }
 0x35a   : > { %v1212_v49 = vsel %vm1211_vm10, %v2308_v40, %v1208_v47 }
 0x35b   : > { %v1217_v18 = vsel %vm1214_vm11, %v1216_v14, %v1212_v49  ;;  %v1232_v28 = vsel %vm1231_vm14, %v2310_v1, %v1228_v55 }
 0x35c   : > { %v1239_v5 = vmul.f32 %v1217_v18, %v1196_v48  ;;  %v1237_v33 = vsel %vm1234_vm15, %v1236_v29, %v1232_v28 }
 0x35e   : > { %v1240_v27 = vadd.f32 %v1239_v5, %v684_v19 }
 0x360   : > { %2311 = vtanh.f32 %v1240_v27 }
 0x366   : > { %v2312_v51 = vpop.eup %2311 }
 0x367   : > { %v1242_v63 = vsub.f32 %v3157_v3, %v2312_v51 }
 0x369   : > { %v1243_v31 = vmul.f32 %v1242_v63, %v1237_v33 }
 0x36b   : > { %v3210_v40 = vadd.f32 %v2312_v51, %v1243_v31 }
 0x36d   : > { %v1246_v50 = vrot.slane %v3210_v40, 1  ;;  %v1247_v0 = vrot.slane %v3210_v40, 2  ;;  %v1248_v54 = vrot.slane %v3210_v40, 3  ;;  %1260 = vst [vmem:[%s3032_s20 + $0x3] sm:$0x1] %v3210_v40  ;;  %v1249_v1 = vrot.slane %v3210_v40, 4 }
 0x36e   : > { %v1268_v3 = vpack.c.bf16 %v3210_v40, %v3210_v40  ;;  %v1250_v26 = vrot.slane %v3210_v40, 5  ;;  %v1251_v12 = vrot.slane %v3210_v40, 6  ;;  %v1252_v56 = vrot.slane %v3210_v40, 7 }
 0x36f   : > { %1261 = vst [vmem:[%s3032_s20 + $0xb] sm:$0x1] %v1246_v50 }
 0x370   : > { %1262 = vst [vmem:[%s3032_s20 + $0x13] sm:$0x1] %v1247_v0  ;;  %1277 = vmatmul.bf16.vlgmr.msrb.gmra.mxu2 %v1268_v3  ;;  %1290 = vmatmul.bf16.vlgmr.msra.gmra.mxu3 %v1268_v3 }
 0x371   : > { %1263 = vst [vmem:[%s3032_s20 + $0x1b] sm:$0x1] %v1248_v54  ;;  %1303 = vmatmul.bf16.vlgmr.msra.gmra.mxu0 %v1268_v3  ;;  %1513 = vmatpush.bf16.msrb.mxu2 %v2861_v13 }
 0x372   : > { %1264 = vst [vmem:[%s3032_s20 + $0x23] sm:$0x1] %v1249_v1  ;;  %1596 = vmatpush.bf16.msra.mxu3 %v2833_v7  ;;  %1609 = vmatpush.bf16.msra.mxu0 %v2863_v16 }
 0x373   : > { %1265 = vst [vmem:[%s3032_s20 + $0x2b] sm:$0x1] %v1250_v26 }
 0x374   : > { %1266 = vst [vmem:[%s3032_s20 + $0x33] sm:$0x1] %v1251_v12 }
 0x375   : > { %1267 = vst [vmem:[%s3032_s20 + $0x3b] sm:$0x1] %v1252_v56  ;;  %1514 = vmatpush.bf16.msrb.mxu2 %v2873_v30 }
 0x376   : > { %1597 = vmatpush.bf16.msra.mxu3 %v2836_v11  ;;  %1610 = vmatpush.bf16.msra.mxu0 %v2876_v32 }
 0x379   : > { %1515 = vmatpush.bf16.msrb.mxu2 %v2881_v45 }
 0x37a   : > { %1598 = vmatpush.bf16.msra.mxu3 %v2839_v17  ;;  %1611 = vmatpush.bf16.msra.mxu0 %v2884_v46 }
 0x37d   : > { %1516 = vmatpush.bf16.msrb.mxu2 %v2887_v57 }
 0x37e   : > { %1599 = vmatpush.bf16.msra.mxu3 %v2842_v23  ;;  %1612 = vmatpush.bf16.msra.mxu0 %v2890_v59  ;;  %v658_v23 = vadd.f32 %v3081_v35, %v3004_v15 }
 0x381   : > { %1517 = vmatpush.bf16.msrb.mxu2 %v2895_v6 }
 0x382   : > { %1600 = vmatpush.bf16.msra.mxu3 %v2845_v34  ;;  %1613 = vmatpush.bf16.msra.mxu0 %v2898_v8 }
 0x385   : > { %1518 = vmatpush.bf16.msrb.mxu2 %v2903_v21 }
 0x386   : > { %1601 = vmatpush.bf16.msra.mxu3 %v2848_v43  ;;  %1614 = vmatpush.bf16.msra.mxu0 %v2906_v24 }
 0x389   : > { %1519 = vmatpush.bf16.msrb.mxu2 %v2910_v36 }
 0x38a   : > { %1602 = vmatpush.bf16.msra.mxu3 %v2851_v58  ;;  %1615 = vmatpush.bf16.msra.mxu0 %v2913_v37 }
 0x38d   : > { %1520 = vmatpush.bf16.msrb.mxu2 %v2918_v42 }
 0x38e   : > { %1603 = vmatpush.bf16.msra.mxu3 %v2856_v10  ;;  %1616 = vmatpush.bf16.msra.mxu0 %v2921_v44 }
 0x3ee   : > { %v1304_v7 = vpop.f32.mrf.mxu0 }
 0x3ef   : > { %v1305_v27 = vadd.f32 %v1304_v7, %v3020_v4 }
 0x3f3   : > { %v1278_v11 = vpop.f32.mrf.mxu2  ;;  %v1291_v17 = vpop.f32.mrf.mxu3 }
 0x3f4   : > { %v1279_v34 = vadd.f32 %v1278_v11, %v2995_v60  ;;  %v1292_v43 = vadd.f32 %v1291_v17, %v3008_v25 }
 0x3f6   : > { %v1308_v58 = vadd.f32 %v1279_v34, %v3006_v20  ;;  %v1328_v16 = vadd.f32 %v1292_v43, %v658_v23  ;;  %v1306_v32 = vpop.f32.mrf.mxu0 }
 0x3f8   : > { %v2115_v46 = vmul.f32 -1.442695, %v1308_v58  ;;  %v2116_v59 = vmul.f32 -1.442695, %v1328_v16 }
 0x3fa   : > { %2313 = vpow2.f32 %v2115_v46 }
 0x3fb   : > { %2315 = vpow2.f32 %v2116_v59  ;;  %v1280_v10 = vpop.f32.mrf.mxu2  ;;  %v1293_v8 = vpop.f32.mrf.mxu3 }
 0x400   : > { %v2314_v24 = vpop.eup %2313 }
 0x401   : > { %v2316_v37 = vpop.eup %2315  ;;  %v1312_v44 = vadd.f32 1.0, %v2314_v24 }
 0x402   : > { %v1332_v9 = vadd.f32 1.0, %v2316_v37 }
 0x403   : > { %2317 = vrcp.f32 %v1312_v44  ;;  %v1324_v48 = vand.u32 2147483648, %v1312_v44  ;;  %v1322_v18 = vand.u32 2147483647, %v1312_v44  ;;  %vm1318_vm1 = vweird.f32 %v1312_v44 }
 0x404   : > { %2319 = vrcp.f32 %v1332_v9  ;;  %v1344_v33 = vand.u32 2147483648, %v1332_v9  ;;  %vm1338_vm5 = vweird.f32 %v1332_v9  ;;  %v1342_v31 = vand.u32 2147483647, %v1332_v9 }
 0x405   : > { %v1325_v5 = vor.u32 1.1754944e-38, %v1324_v48  ;;  %vm1323_vm3 = vcmp.eq.f32.partialorder %v1322_v18, 8.507059e+37 }
 0x406   : > { %v1345_v54 = vor.u32 1.1754944e-38, %v1344_v33  ;;  %vm1343_vm7 = vcmp.eq.f32.partialorder %v1342_v31, 8.507059e+37 }
 0x409   : > { %v2318_v35 = vpop.eup %2317 }
 0x40a   : > { %v2320_v47 = vpop.eup %2319  ;;  %v1314_v62 = vmul.f32 %v2318_v35, %v1312_v44  ;;  %vm1319_vm0 = vweird.f32 %v2318_v35 }
 0x40b   : > { %v1334_v20 = vmul.f32 %v2320_v47, %v1332_v9  ;;  %vm1320_vm2 = vmor %vm1318_vm1, %vm1319_vm0  ;;  %vm1339_vm4 = vweird.f32 %v2320_v47 }
 0x40c   : > { %v1315_v14 = vsub.f32 1.0, %v1314_v62  ;;  %vm1340_vm6 = vmor %vm1338_vm5, %vm1339_vm4 }
 0x40d   : > { %v1335_v61 = vsub.f32 1.0, %v1334_v20 }
 0x40e   : > { %v1316_v49 = vmul.f32 %v2318_v35, %v1315_v14 }
 0x40f   : > { %v1336_v51 = vmul.f32 %v2320_v47, %v1335_v61 }
 0x410   : > { %v1317_v19 = vadd.f32 %v2318_v35, %v1316_v49 }
 0x411   : > { %v1337_v63 = vadd.f32 %v2320_v47, %v1336_v51 }
 0x412   : > { %v1321_v55 = vsel %vm1320_vm2, %v2318_v35, %v1317_v19 }
 0x413   : > { %v1326_v22 = vsel %vm1323_vm3, %v1325_v5, %v1321_v55  ;;  %v1341_v50 = vsel %vm1340_vm6, %v2320_v47, %v1337_v63  ;;  %v689_v5 = vadd.f32 %v3087_v53, %v3018_v2 }
 0x414   : > { %v1348_v28 = vmul.f32 %v1326_v22, %v1305_v27  ;;  %v1346_v38 = vsel %vm1343_vm7, %v1345_v54, %v1341_v50 }
 0x416   : > { %v1349_v29 = vadd.f32 %v1348_v28, %v687_v41 }
 0x418   : > { %2321 = vtanh.f32 %v1349_v29 }
 0x41e   : > { %v2322_v0 = vpop.eup %2321 }
 0x41f   : > { %v1351_v1 = vsub.f32 %v3210_v40, %v2322_v0 }
 0x421   : > { %v1352_v3 = vmul.f32 %v1351_v1, %v1346_v38 }
 0x423   : > { %v3263_v26 = vadd.f32 %v2322_v0, %v1352_v3 }
 0x425   : > { %v1355_v12 = vrot.slane %v3263_v26, 1  ;;  %v1356_v56 = vrot.slane %v3263_v26, 2  ;;  %v1357_v7 = vrot.slane %v3263_v26, 3  ;;  %1369 = vst [vmem:[%s3032_s20 + $0x4] sm:$0x1] %v3263_v26  ;;  %v1358_v11 = vrot.slane %v3263_v26, 4 }
 0x426   : > { %v1377_v40 = vpack.c.bf16 %v3263_v26, %v3263_v26  ;;  %v1359_v17 = vrot.slane %v3263_v26, 5  ;;  %v1360_v23 = vrot.slane %v3263_v26, 6  ;;  %v1361_v34 = vrot.slane %v3263_v26, 7 }
 0x427   : > { %1370 = vst [vmem:[%s3032_s20 + $0xc] sm:$0x1] %v1355_v12 }
 0x428   : > { %1371 = vst [vmem:[%s3032_s20 + $0x14] sm:$0x1] %v1356_v56  ;;  %1386 = vmatmul.bf16.vlgmr.msra.gmra.mxu1 %v1377_v40  ;;  %1399 = vmatmul.bf16.vlgmr.msra.gmra.mxu2 %v1377_v40 }
 0x429   : > { %1372 = vst [vmem:[%s3032_s20 + $0x1c] sm:$0x1] %v1357_v7  ;;  %1412 = vmatmul.bf16.vlgmr.msrb.gmra.mxu3 %v1377_v40  ;;  %1622 = vmatpush.bf16.msra.mxu1 %v2861_v13  ;;  %v3458_v40 = vld [vmem:[#allocation26_spill] sm:$0xff] }
 0x42a   : > { %1373 = vst [vmem:[%s3032_s20 + $0x24] sm:$0x1] %v1358_v11 }
 0x42b   : > { %1374 = vst [vmem:[%s3032_s20 + $0x2c] sm:$0x1] %v1359_v17  ;;  %v663_v17 = vadd.f32 %v3458_v40, %v3004_v15 }
 0x42c   : > { %1375 = vst [vmem:[%s3032_s20 + $0x34] sm:$0x1] %v1360_v23 }
 0x42d   : > { %1376 = vst [vmem:[%s3032_s20 + $0x3c] sm:$0x1] %v1361_v34  ;;  %1623 = vmatpush.bf16.msra.mxu1 %v2873_v30  ;;  %v660_v30 = vadd.f32 %v3085_v52, %v3004_v15 }
 0x431   : > { %1624 = vmatpush.bf16.msra.mxu1 %v2881_v45 }
 0x435   : > { %1625 = vmatpush.bf16.msra.mxu1 %v2887_v57 }
 0x439   : > { %1626 = vmatpush.bf16.msra.mxu1 %v2895_v6 }
 0x43d   : > { %1627 = vmatpush.bf16.msra.mxu1 %v2903_v21 }
 0x441   : > { %1628 = vmatpush.bf16.msra.mxu1 %v2910_v36 }
 0x445   : > { %1629 = vmatpush.bf16.msra.mxu1 %v2918_v42 }
 0x4a5   : > { %v1387_v43 = vpop.f32.mrf.mxu1 }
 0x4a6   : > { %v1388_v13 = vadd.f32 %v1387_v43, %v2995_v60  ;;  %v3459_v43 = vld [vmem:[#allocation24_spill] sm:$0xff] }
 0x4a8   : > { %v1417_v58 = vadd.f32 %v1388_v13, %v3012_v39 }
 0x4aa   : > { %v2117_v16 = vmul.f32 -1.442695, %v1417_v58 }
 0x4ab   : > { %v1400_v32 = vpop.f32.mrf.mxu2 }
 0x4ac   : > { %2323 = vpow2.f32 %v2117_v16  ;;  %v1401_v45 = vadd.f32 %v1400_v32, %v3008_v25  ;;  %v1413_v57 = vpop.f32.mrf.mxu3 }
 0x4ad   : > { %v1389_v6 = vpop.f32.mrf.mxu1  ;;  %v1414_v49 = vadd.f32 %v1413_v57, %v3020_v4 }
 0x4ae   : > { %v1437_v21 = vadd.f32 %v1401_v45, %v660_v30 }
 0x4b0   : > { %v2118_v46 = vmul.f32 -1.442695, %v1437_v21 }
 0x4b2   : > { %v2324_v36 = vpop.eup %2323  ;;  %2325 = vpow2.f32 %v2118_v46 }
 0x4b3   : > { %v1421_v42 = vadd.f32 1.0, %v2324_v36  ;;  %v1402_v59 = vpop.f32.mrf.mxu2 }
 0x4b4   : > { %v1415_v10 = vpop.f32.mrf.mxu3 }
 0x4b5   : > { %2327 = vrcp.f32 %v1421_v42  ;;  %v1433_v52 = vand.u32 2147483648, %v1421_v42  ;;  %v1431_v35 = vand.u32 2147483647, %v1421_v42  ;;  %vm1427_vm9 = vweird.f32 %v1421_v42 }
 0x4b7   : > { %v1434_v48 = vor.u32 1.1754944e-38, %v1433_v52  ;;  %vm1432_vm11 = vcmp.eq.f32.partialorder %v1431_v35, 8.507059e+37 }
 0x4b8   : > { %v2326_v8 = vpop.eup %2325 }
 0x4b9   : > { %v1441_v39 = vadd.f32 1.0, %v2326_v8 }
 0x4bb   : > { %v2328_v24 = vpop.eup %2327  ;;  %2329 = vrcp.f32 %v1441_v39  ;;  %v1453_v41 = vand.u32 2147483648, %v1441_v39  ;;  %vm1447_vm13 = vweird.f32 %v1441_v39  ;;  %v1451_v28 = vand.u32 2147483647, %v1441_v39 }
 0x4bc   : > { %v1423_v37 = vmul.f32 %v2328_v24, %v1421_v42  ;;  %vm1428_vm8 = vweird.f32 %v2328_v24 }
 0x4bd   : > { %vm1429_vm10 = vmor %vm1427_vm9, %vm1428_vm8  ;;  %v1454_v63 = vor.u32 1.1754944e-38, %v1453_v41  ;;  %vm1452_vm15 = vcmp.eq.f32.partialorder %v1451_v28, 8.507059e+37 }
 0x4be   : > { %v1424_v44 = vsub.f32 1.0, %v1423_v37 }
 0x4c0   : > { %v1425_v9 = vmul.f32 %v2328_v24, %v1424_v44 }
 0x4c1   : > { %v2330_v47 = vpop.eup %2329 }
 0x4c2   : > { %v1443_v62 = vmul.f32 %v2330_v47, %v1441_v39  ;;  %v1426_v14 = vadd.f32 %v2328_v24, %v1425_v9  ;;  %vm1448_vm12 = vweird.f32 %v2330_v47 }
 0x4c3   : > { %vm1449_vm14 = vmor %vm1447_vm13, %vm1448_vm12 }
 0x4c4   : > { %v1444_v20 = vsub.f32 1.0, %v1443_v62  ;;  %v1430_v18 = vsel %vm1429_vm10, %v2328_v24, %v1426_v14 }
 0x4c5   : > { %v1435_v19 = vsel %vm1432_vm11, %v1434_v48, %v1430_v18 }
 0x4c6   : > { %v1457_v61 = vmul.f32 %v1435_v19, %v1414_v49  ;;  %v1445_v27 = vmul.f32 %v2330_v47, %v1444_v20  ;;  %v3460_v20 = vld [vmem:[#allocation27_spill] sm:$0xff] }
 0x4c7   : > { %v692_v49 = vadd.f32 %v3460_v20, %v3018_v2 }
 0x4c8   : > { %v1458_v55 = vadd.f32 %v1457_v61, %v689_v5  ;;  %v1446_v22 = vadd.f32 %v2330_v47, %v1445_v27 }
 0x4ca   : > { %2331 = vtanh.f32 %v1458_v55  ;;  %v1450_v51 = vsel %vm1449_vm14, %v2330_v47, %v1446_v22 }
 0x4cb   : > { %v1455_v53 = vsel %vm1452_vm15, %v1454_v63, %v1450_v51 }
 0x4d0   : > { %v2332_v29 = vpop.eup %2331 }
 0x4d1   : > { %v1460_v33 = vsub.f32 %v3263_v26, %v2332_v29 }
 0x4d3   : > { %v1461_v31 = vmul.f32 %v1460_v33, %v1455_v53 }
 0x4d5   : > { %v3300_v50 = vadd.f32 %v2332_v29, %v1461_v31 }
 0x4d7   : > { %v1464_v0 = vrot.slane %v3300_v50, 1  ;;  %v1465_v54 = vrot.slane %v3300_v50, 2  ;;  %v1466_v1 = vrot.slane %v3300_v50, 3  ;;  %1478 = vst [vmem:[%s3032_s20 + $0x5] sm:$0x1] %v3300_v50  ;;  %v1467_v38 = vrot.slane %v3300_v50, 4 }
 0x4d8   : > { %v1486_v3 = vpack.c.bf16 %v3300_v50, %v3300_v50  ;;  %v1468_v26 = vrot.slane %v3300_v50, 5  ;;  %v1469_v12 = vrot.slane %v3300_v50, 6  ;;  %v1470_v56 = vrot.slane %v3300_v50, 7 }
 0x4d9   : > { %1479 = vst [vmem:[%s3032_s20 + $0xd] sm:$0x1] %v1464_v0 }
 0x4da   : > { %1480 = vst [vmem:[%s3032_s20 + $0x15] sm:$0x1] %v1465_v54  ;;  %1495 = vmatmul.bf16.vlgmr.msrb.gmra.mxu0 %v1486_v3  ;;  %1508 = vmatmul.bf16.vlgmr.msrb.gmra.mxu1 %v1486_v3 }
 0x4db   : > { %1481 = vst [vmem:[%s3032_s20 + $0x1d] sm:$0x1] %v1466_v1  ;;  %1521 = vmatmul.bf16.vlgmr.msrb.gmra.mxu2 %v1486_v3 }
 0x4dc   : > { %1482 = vst [vmem:[%s3032_s20 + $0x25] sm:$0x1] %v1467_v38 }
 0x4dd   : > { %1483 = vst [vmem:[%s3032_s20 + $0x2d] sm:$0x1] %v1468_v26 }
 0x4de   : > { %1484 = vst [vmem:[%s3032_s20 + $0x35] sm:$0x1] %v1469_v12  ;;  %v3461_v12 = vld [vmem:[#allocation28_spill] sm:$0xff] }
 0x4df   : > { %1485 = vst [vmem:[%s3032_s20 + $0x3d] sm:$0x1] %v1470_v56  ;;  %v665_v56 = vadd.f32 %v3461_v12, %v3004_v15 }
 0x557   : > { %v1496_v7 = vpop.f32.mrf.mxu0  ;;  %v1509_v11 = vpop.f32.mrf.mxu1 }
 0x558   : > { %v1497_v23 = vadd.f32 %v1496_v7, %v2995_v60  ;;  %v1510_v34 = vadd.f32 %v1509_v11, %v3008_v25 }
 0x55a   : > { %v1526_v13 = vadd.f32 %v1497_v23, %v3459_v43  ;;  %v1546_v58 = vadd.f32 %v1510_v34, %v663_v17 }
 0x55c   : > { %v2119_v16 = vmul.f32 -1.442695, %v1526_v13  ;;  %v2120_v32 = vmul.f32 -1.442695, %v1546_v58  ;;  %v3462_v13 = vld [vmem:[#allocation25_spill] sm:$0xff] }
 0x55e   : > { %2333 = vpow2.f32 %v2119_v16  ;;  %v1522_v30 = vpop.f32.mrf.mxu2 }
 0x55f   : > { %2335 = vpow2.f32 %v2120_v32  ;;  %v1498_v45 = vpop.f32.mrf.mxu0  ;;  %v1511_v57 = vpop.f32.mrf.mxu1  ;;  %v1523_v62 = vadd.f32 %v1522_v30, %v3020_v4 }
 0x564   : > { %v2334_v6 = vpop.eup %2333 }
 0x565   : > { %v2336_v21 = vpop.eup %2335  ;;  %v1530_v46 = vadd.f32 1.0, %v2334_v6 }
 0x566   : > { %v1550_v36 = vadd.f32 1.0, %v2336_v21  ;;  %v1524_v42 = vpop.f32.mrf.mxu2 }
 0x567   : > { %2337 = vrcp.f32 %v1530_v46  ;;  %v1542_v37 = vand.u32 2147483648, %v1530_v46  ;;  %v1540_v52 = vand.u32 2147483647, %v1530_v46  ;;  %vm1536_vm1 = vweird.f32 %v1530_v46 }
 0x568   : > { %2339 = vrcp.f32 %v1550_v36  ;;  %v1562_v27 = vand.u32 2147483648, %v1550_v36  ;;  %vm1556_vm5 = vweird.f32 %v1550_v36  ;;  %v1560_v55 = vand.u32 2147483647, %v1550_v36 }
 0x569   : > { %v1543_v47 = vor.u32 1.1754944e-38, %v1542_v37  ;;  %vm1541_vm3 = vcmp.eq.f32.partialorder %v1540_v52, 8.507059e+37 }
 0x56a   : > { %v1563_v28 = vor.u32 1.1754944e-38, %v1562_v27  ;;  %vm1561_vm7 = vcmp.eq.f32.partialorder %v1560_v55, 8.507059e+37 }
 0x56d   : > { %v2338_v59 = vpop.eup %2337 }
 0x56e   : > { %v2340_v10 = vpop.eup %2339  ;;  %v1532_v8 = vmul.f32 %v2338_v59, %v1530_v46  ;;  %vm1537_vm0 = vweird.f32 %v2338_v59 }
 0x56f   : > { %v1552_v24 = vmul.f32 %v2340_v10, %v1550_v36  ;;  %vm1538_vm2 = vmor %vm1536_vm1, %vm1537_vm0  ;;  %vm1557_vm4 = vweird.f32 %v2340_v10 }
 0x570   : > { %v1533_v39 = vsub.f32 1.0, %v1532_v8  ;;  %vm1558_vm6 = vmor %vm1556_vm5, %vm1557_vm4 }
 0x571   : > { %v1553_v35 = vsub.f32 1.0, %v1552_v24 }
 0x572   : > { %v1534_v44 = vmul.f32 %v2338_v59, %v1533_v39 }
 0x573   : > { %v1554_v19 = vmul.f32 %v2340_v10, %v1553_v35 }
 0x574   : > { %v1535_v9 = vadd.f32 %v2338_v59, %v1534_v44 }
 0x575   : > { %v1555_v61 = vadd.f32 %v2340_v10, %v1554_v19 }
 0x576   : > { %v1539_v14 = vsel %vm1538_vm2, %v2338_v59, %v1535_v9  ;;  %v3463_v9 = vld [vmem:[#allocation29_spill] sm:$0xff] }
 0x577   : > { %v1544_v48 = vsel %vm1541_vm3, %v1543_v47, %v1539_v14  ;;  %v1559_v22 = vsel %vm1558_vm6, %v2340_v10, %v1555_v61  ;;  %v694_v35 = vadd.f32 %v3463_v9, %v3018_v2 }
 0x578   : > { %v1566_v18 = vmul.f32 %v1544_v48, %v1523_v62  ;;  %v1564_v29 = vsel %vm1561_vm7, %v1563_v28, %v1559_v22 }
 0x57a   : > { %v1567_v5 = vadd.f32 %v1566_v18, %v692_v49 }
 0x57c   : > { %2341 = vtanh.f32 %v1567_v5 }
 0x582   : > { %v2342_v41 = vpop.eup %2341 }
 0x583   : > { %v1569_v51 = vsub.f32 %v3300_v50, %v2342_v41 }
 0x585   : > { %v1570_v63 = vmul.f32 %v1569_v51, %v1564_v29 }
 0x587   : > { %v3329_v33 = vadd.f32 %v2342_v41, %v1570_v63 }
 0x589   : > { %v1573_v53 = vrot.slane %v3329_v33, 1  ;;  %v1574_v31 = vrot.slane %v3329_v33, 2  ;;  %v1575_v0 = vrot.slane %v3329_v33, 3  ;;  %1587 = vst [vmem:[%s3032_s20 + $0x6] sm:$0x1] %v3329_v33  ;;  %v1576_v54 = vrot.slane %v3329_v33, 4 }
 0x58a   : > { %v1595_v50 = vpack.c.bf16 %v3329_v33, %v3329_v33  ;;  %v1577_v1 = vrot.slane %v3329_v33, 5  ;;  %v1578_v38 = vrot.slane %v3329_v33, 6  ;;  %v1579_v3 = vrot.slane %v3329_v33, 7 }
 0x58b   : > { %1588 = vst [vmem:[%s3032_s20 + $0xe] sm:$0x1] %v1573_v53 }
 0x58c   : > { %1589 = vst [vmem:[%s3032_s20 + $0x16] sm:$0x1] %v1574_v31  ;;  %1604 = vmatmul.bf16.vlgmr.msra.gmra.mxu3 %v1595_v50  ;;  %1617 = vmatmul.bf16.vlgmr.msra.gmra.mxu0 %v1595_v50 }
 0x58d   : > { %1590 = vst [vmem:[%s3032_s20 + $0x1e] sm:$0x1] %v1575_v0  ;;  %1630 = vmatmul.bf16.vlgmr.msra.gmra.mxu1 %v1595_v50 }
 0x58e   : > { %1591 = vst [vmem:[%s3032_s20 + $0x26] sm:$0x1] %v1576_v54 }
 0x58f   : > { %1592 = vst [vmem:[%s3032_s20 + $0x2e] sm:$0x1] %v1577_v1 }
 0x590   : > { %1593 = vst [vmem:[%s3032_s20 + $0x36] sm:$0x1] %v1578_v38 }
 0x591   : > { %1594 = vst [vmem:[%s3032_s20 + $0x3e] sm:$0x1] %v1579_v3 }
 0x609   : > { %v1618_v26 = vpop.f32.mrf.mxu0 }
 0x60a   : > { %v1619_v7 = vadd.f32 %v1618_v26, %v3008_v25  ;;  %v1631_v11 = vpop.f32.mrf.mxu1 }
 0x60b   : > { %v1632_v37 = vadd.f32 %v1631_v11, %v3020_v4 }
 0x60c   : > { %v1655_v40 = vadd.f32 %v1619_v7, %v665_v56 }
 0x60e   : > { %v2122_v17 = vmul.f32 -1.442695, %v1655_v40 }
 0x60f   : > { %v1605_v23 = vpop.f32.mrf.mxu3 }
 0x610   : > { %v1606_v34 = vadd.f32 %v1605_v23, %v2995_v60  ;;  %2343 = vpow2.f32 %v2122_v17 }
 0x611   : > { %v1620_v43 = vpop.f32.mrf.mxu0 }
 0x612   : > { %v1635_v58 = vadd.f32 %v1606_v34, %v3462_v13  ;;  %v1633_v16 = vpop.f32.mrf.mxu1 }
 0x614   : > { %v2121_v32 = vmul.f32 -1.442695, %v1635_v58 }
 0x616   : > { %2345 = vpow2.f32 %v2121_v32  ;;  %v2344_v45 = vpop.eup %2343 }
 0x617   : > { %v1607_v30 = vpop.f32.mrf.mxu3  ;;  %v1659_v6 = vadd.f32 1.0, %v2344_v45 }
 0x619   : > { %v1671_v20 = vand.u32 2147483648, %v1659_v6  ;;  %vm1665_vm13 = vweird.f32 %v1659_v6  ;;  %v1669_v49 = vand.u32 2147483647, %v1659_v6 }
 0x61b   : > { %v1672_v19 = vor.u32 1.1754944e-38, %v1671_v20  ;;  %vm1670_vm15 = vcmp.eq.f32.partialorder %v1669_v49, 8.507059e+37 }
 0x61c   : > { %v2346_v57 = vpop.eup %2345 }
 0x61d   : > { %v1639_v15 = vadd.f32 1.0, %v2346_v57 }
 0x61f   : > { %2347 = vrcp.f32 %v1639_v15  ;;  %v1651_v60 = vand.u32 2147483648, %v1639_v15  ;;  %v1649_v10 = vand.u32 2147483647, %v1639_v15  ;;  %vm1645_vm9 = vweird.f32 %v1639_v15 }
 0x620   : > { %2349 = vrcp.f32 %v1659_v6 }
 0x621   : > { %v1652_v24 = vor.u32 1.1754944e-38, %v1651_v60  ;;  %vm1650_vm11 = vcmp.eq.f32.partialorder %v1649_v10, 8.507059e+37 }
 0x625   : > { %v2348_v25 = vpop.eup %2347 }
 0x626   : > { %v2350_v21 = vpop.eup %2349  ;;  %v1641_v46 = vmul.f32 %v2348_v25, %v1639_v15  ;;  %vm1646_vm8 = vweird.f32 %v2348_v25 }
 0x627   : > { %v1661_v42 = vmul.f32 %v2350_v21, %v1659_v6  ;;  %vm1647_vm10 = vmor %vm1645_vm9, %vm1646_vm8  ;;  %vm1666_vm12 = vweird.f32 %v2350_v21 }
 0x628   : > { %v1642_v36 = vsub.f32 1.0, %v1641_v46  ;;  %vm1667_vm14 = vmor %vm1665_vm13, %vm1666_vm12 }
 0x629   : > { %v1662_v39 = vsub.f32 1.0, %v1661_v42 }
 0x62a   : > { %v1643_v59 = vmul.f32 %v2348_v25, %v1642_v36 }
 0x62b   : > { %v1663_v62 = vmul.f32 %v2350_v21, %v1662_v39 }
 0x62c   : > { %v1644_v8 = vadd.f32 %v2348_v25, %v1643_v59 }
 0x62d   : > { %v1664_v48 = vadd.f32 %v2350_v21, %v1663_v62 }
 0x62e   : > { %v1648_v44 = vsel %vm1647_vm10, %v2348_v25, %v1644_v8 }
 0x62f   : > { %v1653_v52 = vsel %vm1650_vm11, %v1652_v24, %v1648_v44  ;;  %v1668_v4 = vsel %vm1667_vm14, %v2350_v21, %v1664_v48 }
 0x630   : > { %v1675_v47 = vmul.f32 %v1653_v52, %v1632_v37  ;;  %v1673_v5 = vsel %vm1670_vm15, %v1672_v19, %v1668_v4 }
 0x632   : > { %v1676_v14 = vadd.f32 %v1675_v47, %v694_v35 }
 0x634   : > { %2351 = vtanh.f32 %v1676_v14 }
 0x63a   : > { %v2352_v18 = vpop.eup %2351 }
 0x63b   : > { %v1678_v2 = vsub.f32 %v3329_v33, %v2352_v18 }
 0x63d   : > { %v1679_v61 = vmul.f32 %v1678_v2, %v1673_v5 }
 0x63f   : > { %v1680_v27 = vadd.f32 %v2352_v18, %v1679_v61 }
 0x641   : > { %v1682_v55 = vrot.slane %v1680_v27, 1  ;;  %v1683_v22 = vrot.slane %v1680_v27, 2  ;;  %v1684_v41 = vrot.slane %v1680_v27, 3  ;;  %1696 = vst [vmem:[%s3032_s20 + $0x7] sm:$0x1] %v1680_v27  ;;  %v1685_v28 = vrot.slane %v1680_v27, 4 }
 0x642   : > { %1704 = vst [vmem:[%s394_s9] sm:$0xff] %v1680_v27  ;;  %v1686_v51 = vrot.slane %v1680_v27, 5 }
 0x643   : > { %1697 = vst [vmem:[%s3032_s20 + $0xf] sm:$0x1] %v1682_v55 }
 0x644   : > { %2530 = shalt.err (!%p2527_p9)
}
 0x645   : > { %2196 = dma.vmem_to_hbm [thread:$0]  (%p2748_p7), %s1741_s5, 128, %s1743_s17, %s1711_s10   ;;  %v1687_v29 = vrot.slane %v1680_v27, 6  ;;  %1698 = vst [vmem:[%s3032_s20 + $0x17] sm:$0x1] %v1683_v22  ;;  %v1688_v63 = vrot.slane %v1680_v27, 7 }
 0x646   : > { %1699 = vst [vmem:[%s3032_s20 + $0x1f] sm:$0x1] %v1684_v41  ;;  %s1706_s21 = scalar_lea.sflag [#allocation4], %s2803_s26  ;;  %s2545_s23 = sshra.s32 %s1726_s29, 4  ;;  %s2546_s23 = int_to_ptr.hbm [resolvable:$true] %s2545_s23 }
 0x647   : > { %1700 = vst [vmem:[%s3032_s20 + $0x27] sm:$0x1] %v1685_v28  ;;  %s2547_s2 = scalar_lea.hbm %s2546_s23, 64  ;;  %s2551_s9 = scalar_lea.hbm %s3426_s6, 128 }
 0x648   : > { %1701 = vst [vmem:[%s3032_s20 + $0x2f] sm:$0x1] %v1686_v51  ;;  %p2548_p12 = scmp.ne.s32.totalorder %s2546_s23, %s2547_s2  ;;  %p2552_p3 = scmp.lt.s32.totalorder %s2546_s23, %s3426_s6 }
 0x649   : > { %1702 = vst [vmem:[%s3032_s20 + $0x37] sm:$0x1] %v1687_v29  ;;  %p2553_p5 = scmp.lt.s32.totalorder %s2551_s9, %s2547_s2 }
 0x64a   : > { %1703 = vst [vmem:[%s3032_s20 + $0x3f] sm:$0x1] %v1688_v63  ;;  %p2549_p13 = pnand %p2548_p12, %p2748_p7 }
 0x64b   : > { %p2554_p1 = por %p2553_p5, %p2552_p3 }
 0x64c   : > { %p2550_p0 = pneg %p2549_p13 }
 0x64e   : > { %p2555_p4 = pnand %p2554_p1, %p2550_p0 }
 0x650   : > { %2558 = shalt.err (!%p2555_p4)
}
 0x651   : > { %s2623_s26 = smov 128   ;;  %s2624_s20 = smov 8  }
 0x652   : > { %2195 = dma.vmem_to_hbm [thread:$0]  (%p2748_p7), %s1724_s28, 1024, %s1726_s29, %s1706_s21, %s2623_s26, %s2623_s26, %s2624_s20  }
 0x653 PF: > { %s1754_s11 = sand.u32 1, %s2601_s24   ;;  %p3465_p8 = scmp.ge.s32.totalorder %s2613_s27, 2 }
 0x654   : > { %s1755_s15 = scalar_lea.sflag [#allocation4], %s1754_s11 }
 0x655   : > { %p2217_p2 = pnand %p3465_p8, %p2700_p6 }
 0x657   : > { %p2218_p10 = pneg %p2217_p2 }
 0x659   : > { %2592 = dma.done.wait (%p2218_p10), %s1755_s15, 1024  }
 0x65a   : > { %2594 = vsyncadd (%p2218_p10), %s1755_s15, 4294966272  ;;  %s1765_s10 = scalar_lea.sflag [#allocation13], %s1754_s11 }
 0x65b   : > { %2596 = dma.done.wait (%p2218_p10), %s1765_s10, 128  }
 0x65c   : > { %2598 = vsyncadd (%p2218_p10), %s1765_s10, 4294967168  ;;  %s3466_s27 = sld [smem:[#allocation22_spill]]  ;;  %s3469_s24 = smov %s2605_s25 }
 0x65d   : > { %s3467_s0 = sld [smem:[#allocation20_spill]] }
 0x65e   : > { %s3468_s26 = sld [smem:[#allocation23_spill]] }
 0x662   : > { %p28_p7 = scmp.ge.s32.totalorder %s3466_s27, 4  }
 0x663   : > { %s3470_s25 = smov %s3467_s0 }
 0x664   :  { %30 = sbr.rel (!%p28_p7) target bundleno = 15 (0xf), region = 131 }
 0x669   :  { %1771 = vsyncpa [#allocation3], 1 }
 0x66a   :  { %1773 = vsyncpa [#allocation3 + $0x1], 1 }
 0x66b   :  { %1774 = vsyncpa [#allocation6], 1 }
 0x66c   :  { %1776 = vsyncpa [#allocation6 + $0x1], 1 }
 0x66d   :  { %1777 = vsyncpa [#allocation9], 1 }
 0x66e   :  { %1778 = vsyncpa [#allocation4], 1 }
 0x66f   :  { %1780 = vsyncpa [#allocation4 + $0x1], 1 }
 0x670   :  { %1781 = vsyncpa [#allocation13], 1 }
 0x671   :  { %1783 = vsyncpa [#allocation13 + $0x1], 1 }

</bundles_post_ra>
